<compile_context>
chip_gen: v7x
topology: tpu7x:2x2x1
jax: 0.10.0
libtpu: 0.0.40
codegen_flags: <defaults>
</compile_context>

<pallas_src>
import math

import jax
import jax.numpy as jnp
from jax.experimental import pallas as pl
from jax.experimental.pallas import tpu as pltpu

# ----------------------------- config ---------------------------------------
VOCAB = 64
HIDDEN = 32          # emb_size of the (synthetic) backbone
N_HEADS = 2
HEAD_DIM = HIDDEN // N_HEADS
INTER = 64
N_LAYERS = 2
MAX_POS = 32
FEAT_DIM = 16        # feat_dim of contrast head
LN_EPS = 1e-12
NORM_EPS = 1e-12     # F.normalize eps
NEG_INF = -1e9

# ----------------- packed weight-slab layout (static ints) -------------------
W_COLS = 3 * HIDDEN                        # 96 = widest matmul weight (wqkv)
W_PER_LAYER = 3 * HIDDEN + INTER           # 160 rows: wqkv(32)+wo(32)+wi(32)+wo2(64)
W_HEAD_BASE = N_LAYERS * W_PER_LAYER       # 320
W_ROWS = W_HEAD_BASE + 2 * HIDDEN          # 384 (hw1: 32 rows, hw2: 32 rows)

V_COLS = 3 * HIDDEN                        # 96
V_PER_LAYER = 8                            # bqkv,bo,g1,be1,bi,bo2,g2,be2
V_LAYER_BASE = 2                           # rows 0,1 = embedding LN gamma/beta
V_ROWS = V_LAYER_BASE + N_LAYERS * V_PER_LAYER   # 18

OUT_W = 128                                # lane-dense output: [mean | feat | pad]


# --------------------------- small math helpers ------------------------------
def _layernorm(x, g, b):
    mu = jnp.mean(x, axis=-1, keepdims=True)
    var = jnp.mean((x - mu) * (x - mu), axis=-1, keepdims=True)
    return (x - mu) * jax.lax.rsqrt(var + LN_EPS) * g + b


def _erf(x):
    # Abramowitz & Stegun 7.1.26 polynomial, |err| <= 1.5e-7.
    a1, a2, a3, a4, a5 = 0.254829592, -0.284496736, 1.421413741, -1.453152027, 1.061405429
    p = 0.3275911
    ax = jnp.where(x >= 0.0, x, -x)
    t = 1.0 / (1.0 + p * ax)
    poly = ((((a5 * t + a4) * t + a3) * t + a2) * t + a1) * t
    y = 1.0 - poly * jnp.exp(-(ax * ax))
    return jnp.where(x >= 0.0, y, -y)


def _gelu_exact(x):
    # exact (erf-based) GELU, matching PyTorch BERT / DNABERT-2
    return 0.5 * x * (1.0 + _erf(x * 0.7071067811865476))


# --------------------------- fused Pallas kernel ------------------------------
def _fused_forward_kernel(x_ref, mask_ref, bias_ref, wmat_ref, vecs_ref, out_ref):
    """Full BERT encoder + masked mean pooling + contrast head + L2 normalize.

    x_ref:    (BT, S, H) f32  embedding sum (pre-LayerNorm)
    mask_ref: (BT, S)    f32  attention mask (1 keep, 0 pad)
    bias_ref: (T, T)     f32  block-diagonal + key-padding additive bias
    wmat_ref: (W_ROWS, W_COLS) bf16  packed matmul weights
    vecs_ref: (V_ROWS, V_COLS) f32   packed biases / LayerNorm params
    out_ref:  (BT, OUT_W) f32  lane-dense [mean(0:H) | feat(H:H+F) | zeros]
    """
    BT, S, H = x_ref.shape
    T = BT * S
    f32, bf16 = jnp.float32, jnp.bfloat16

    mask = mask_ref[...]                       # (BT, S)
    bias = bias_ref[...]                       # (T, T) — hoisted once, reused everywhere

    # Embedding LayerNorm, token-major (T, H)
    x = _layernorm(x_ref[...].reshape(T, H), vecs_ref[0:1, :H], vecs_ref[1:2, :H])

    for l in range(N_LAYERS):                  # static unroll
        wb = l * W_PER_LAYER
        vb = V_LAYER_BASE + l * V_PER_LAYER
        wqkv = wmat_ref[wb:wb + H, :3 * H]                      # (H, 3H)  bf16
        wo   = wmat_ref[wb + H:wb + 2 * H, :H]                  # (H, H)   bf16
        wi   = wmat_ref[wb + 2 * H:wb + 3 * H, :INTER]          # (H, I)   bf16
        wo2  = wmat_ref[wb + 3 * H:wb + 3 * H + INTER, :H]      # (I, H)   bf16
        bqkv = vecs_ref[vb + 0:vb + 1, :3 * H]
        bo   = vecs_ref[vb + 1:vb + 2, :H]
        g1   = vecs_ref[vb + 2:vb + 3, :H]
        be1  = vecs_ref[vb + 3:vb + 4, :H]
        bi   = vecs_ref[vb + 4:vb + 5, :INTER]
        bo2  = vecs_ref[vb + 5:vb + 6, :H]
        g2   = vecs_ref[vb + 6:vb + 7, :H]
        be2  = vecs_ref[vb + 7:vb + 8, :H]

        # ----- self attention -----
        # fused QKV: one bf16 MXU pass; 1/sqrt(HEAD_DIM) pre-folded into q cols/bias
        qkv = jnp.dot(x.astype(bf16), wqkv, preferred_element_type=f32) + bqkv   # (T, 3H)

        ctxs = []
        for h in range(N_HEADS):               # static unroll (2)
            lo = h * HEAD_DIM
            qh = qkv[:, lo:lo + HEAD_DIM].astype(bf16)                 # (T, HD)
            kh = qkv[:, H + lo:H + lo + HEAD_DIM].astype(bf16)
            vh = qkv[:, 2 * H + lo:2 * H + lo + HEAD_DIM].astype(bf16)
            # block-diagonal scores: whole stacked batch in one (T,T) matmul
            s = jnp.einsum('qd,kd->qk', qh, kh,
                           preferred_element_type=f32) + bias          # (T, T)
            m = jnp.max(s, axis=-1, keepdims=True)     # row-max keeps masked rows finite
            e = jnp.exp(s - m)
            p = e * pl.reciprocal(jnp.sum(e, axis=-1, keepdims=True), approx=True)
            ctxs.append(jnp.dot(p.astype(bf16), vh,
                                preferred_element_type=f32))           # (T, HD)
        ctx = jnp.concatenate(ctxs, axis=-1)                           # (T, H)
        # single fused output projection (replaces per-head wo matmuls + adds)
        attn = jnp.dot(ctx.astype(bf16), wo, preferred_element_type=f32) + bo
        h1 = _layernorm(x + attn, g1, be1)

        # ----- feed-forward -----
        ff = jnp.dot(h1.astype(bf16), wi, preferred_element_type=f32) + bi
        ff = _gelu_exact(ff)
        ff = jnp.dot(ff.astype(bf16), wo2, preferred_element_type=f32) + bo2
        x = _layernorm(h1 + ff, g2, be2)

    # ----- masked mean pooling -----
    x3 = x.reshape(BT, S, H)
    denom = jnp.maximum(jnp.sum(mask, axis=1, keepdims=True), 1e-9)    # (BT, 1)
    mean = jnp.sum(x3 * mask[:, :, None], axis=1) * pl.reciprocal(denom, approx=True)

    # ----- contrast head + L2 normalize -----
    hw1 = wmat_ref[W_HEAD_BASE:W_HEAD_BASE + H, :H]
    hw2 = wmat_ref[W_HEAD_BASE + H:W_HEAD_BASE + 2 * H, :FEAT_DIM]
    z = jnp.maximum(jnp.dot(mean.astype(bf16), hw1, preferred_element_type=f32), 0.0)
    z = jnp.dot(z.astype(bf16), hw2, preferred_element_type=f32)       # (BT, F)
    feat = z * jax.lax.rsqrt(jnp.maximum(jnp.sum(z * z, axis=1, keepdims=True),
                                         NORM_EPS * NORM_EPS))

    # single lane-dense 128-wide store (unmasked vst), sliced in the wrapper
    pad = jnp.zeros((BT, OUT_W - H - FEAT_DIM), f32)
    out_ref[...] = jnp.concatenate([mean, feat, pad], axis=1)


def fused_encode_pool_head(x_emb, mask_f32, packed):
    """Single gridless pallas_call for the whole post-embedding forward."""
    BT, S, H = x_emb.shape
    T = BT * S

    # precomputed additive bias: 0 for same-sequence, unpadded keys; -1e9 otherwise
    # (mandatory cross-sequence mask for the block-diagonal flattening)
    seq_id = jnp.repeat(jnp.arange(BT, dtype=jnp.int32), S)            # (T,)
    same_seq = seq_id[:, None] == seq_id[None, :]                      # (T, T)
    key_keep = mask_f32.reshape(T) > 0.5                               # (T,)
    attn_bias = jnp.where(same_seq & key_keep[None, :], 0.0, NEG_INF).astype(jnp.float32)

    # TODO(synk): at real DNABERT-2 sizes (H=768, 12 layers, S<=512) switch to a
    # grid over tokens/layers with dimension_semantics=("parallel",...) (v7x
    # megacore) and an explicit vmem_limit_bytes; at BT<=4, S=8 a gridless call
    # is fastest since per-step pipeline overhead would dominate.
    out = pl.pallas_call(
        _fused_forward_kernel,
        out_shape=jax.ShapeDtypeStruct((BT, OUT_W), jnp.float32),
        in_specs=[pl.BlockSpec(memory_space=pltpu.MemorySpace.VMEM)] * 5,
        out_specs=pl.BlockSpec(memory_space=pltpu.MemorySpace.VMEM),
    )(x_emb, mask_f32, attn_bias, packed['wmat'], packed['vecs'])
    return out[:, :H], out[:, H:H + FEAT_DIM]


# ------------------------------ model glue -----------------------------------
def embed(params, ids):
    """Embedding lookup (gather) in plain JAX; LayerNorm happens in-kernel."""
    S = ids.shape[1]
    return (params['word_emb'][ids]
            + params['pos_emb'][:S][None, :, :]
            + params['type_emb'][0][None, None, :])


def dnabert_s_forward(params, packed, input_ids, attention_mask):
    """Train-path forward, mix=False: returns (feat1, feat2, mean1, mean2)."""
    B = input_ids.shape[0]
    # stack the sequence pair into one (2B, S) batch: one encoder pass
    ids = jnp.concatenate([input_ids[:, 0], input_ids[:, 1]], axis=0)
    am = jnp.concatenate([attention_mask[:, 0], attention_mask[:, 1]],
                         axis=0).astype(jnp.float32)
    x_emb = embed(params, ids)                                  # (2B, S, H)
    mean, feat = fused_encode_pool_head(x_emb, am, packed)
    return feat[:B], feat[B:], mean[:B], mean[B:]


def get_mean_embeddings(params, packed, input_ids, attention_mask):
    """Evaluate path (task_type='evaluate')."""
    am = attention_mask.astype(jnp.float32)
    x_emb = embed(params, input_ids)
    mean, _ = fused_encode_pool_head(x_emb, am, packed)
    return mean


# ------------------------------ param init -----------------------------------
def init_params(key):
    ks = iter(jax.random.split(key, 64))
    dense = lambda shape: 0.02 * jax.random.normal(next(ks), shape, jnp.float32)

    layers = []
    for _ in range(N_LAYERS):
        layers.append(dict(
            wq=dense((HIDDEN, HIDDEN)), bq=jnp.zeros((1, HIDDEN), jnp.float32),
            wk=dense((HIDDEN, HIDDEN)), bk=jnp.zeros((1, HIDDEN), jnp.float32),
            wv=dense((HIDDEN, HIDDEN)), bv=jnp.zeros((1, HIDDEN), jnp.float32),
            wo=dense((HIDDEN, HIDDEN)), bo=jnp.zeros((1, HIDDEN), jnp.float32),
            g1=jnp.ones((1, HIDDEN), jnp.float32), be1=jnp.zeros((1, HIDDEN), jnp.float32),
            wi=dense((HIDDEN, INTER)), bi=jnp.zeros((1, INTER), jnp.float32),
            wo2=dense((INTER, HIDDEN)), bo2=jnp.zeros((1, HIDDEN), jnp.float32),
            g2=jnp.ones((1, HIDDEN), jnp.float32), be2=jnp.zeros((1, HIDDEN), jnp.float32),
        ))

    return dict(
        word_emb=dense((VOCAB, HIDDEN)),
        pos_emb=dense((MAX_POS, HIDDEN)),
        type_emb=dense((2, HIDDEN)),
        emb_ln_g=jnp.ones((HIDDEN,), jnp.float32),
        emb_ln_b=jnp.zeros((HIDDEN,), jnp.float32),
        layers=layers,
        head_w1=dense((HIDDEN, HIDDEN)),        # Linear(emb, emb, bias=False)
        head_w2=dense((HIDDEN, FEAT_DIM)),      # Linear(emb, feat_dim, bias=False)
    )


def pack_params(params):
    """Static weight re-packing: two flat slabs (bf16 matmul weights, f32 vectors).

    - QKV fused into one (H, 3H) weight; 1/sqrt(HEAD_DIM) folded into q cols/bias.
    - Matmul weights zero-padded to W_COLS lanes and stacked into one bf16 slab
      at static row offsets (single DMA instead of ~16 descriptors).
    - Biases / LayerNorm params stacked into one f32 (V_ROWS, V_COLS) slab.
    """
    scale = 1.0 / math.sqrt(HEAD_DIM)

    def pad_cols(a, width):
        return jnp.pad(a, ((0, 0), (0, width - a.shape[1])))

    wrows, vrows = [], []
    vrows.append(pad_cols(params['emb_ln_g'].reshape(1, HIDDEN), V_COLS))
    vrows.append(pad_cols(params['emb_ln_b'].reshape(1, HIDDEN), V_COLS))
    for lp in params['layers']:
        wqkv = jnp.concatenate([lp['wq'] * scale, lp['wk'], lp['wv']], axis=-1)  # (H,3H)
        bqkv = jnp.concatenate([lp['bq'] * scale, lp['bk'], lp['bv']], axis=-1)  # (1,3H)
        wrows += [pad_cols(wqkv, W_COLS), pad_cols(lp['wo'], W_COLS),
                  pad_cols(lp['wi'], W_COLS), pad_cols(lp['wo2'], W_COLS)]
        vrows += [pad_cols(v, V_COLS) for v in
                  (bqkv, lp['bo'], lp['g1'], lp['be1'],
                   lp['bi'], lp['bo2'], lp['g2'], lp['be2'])]
    wrows += [pad_cols(params['head_w1'], W_COLS), pad_cols(params['head_w2'], W_COLS)]

    wmat = jnp.concatenate(wrows, axis=0).astype(jnp.bfloat16)
    vecs = jnp.concatenate(vrows, axis=0).astype(jnp.float32)
    assert wmat.shape == (W_ROWS, W_COLS) and vecs.shape == (V_ROWS, V_COLS)
    return dict(wmat=wmat, vecs=vecs)


# --------------------------- plain-JAX reference ------------------------------
def _reference_encode_pool_head(params, ids, am):
    """Unfused per-batch reference mirroring the kernel's bf16-MXU precision
    (operand casts / scale folding), but exact division for softmax/pooling."""
    bf16, f32 = jnp.bfloat16, jnp.float32
    scale = 1.0 / math.sqrt(HEAD_DIM)
    x = embed(params, ids)
    x = _layernorm(x, params['emb_ln_g'], params['emb_ln_b'])
    bias = ((am - 1.0) * 1e9)[:, None, :]
    for lp in params['layers']:
        xb = x.astype(bf16)
        q = jnp.dot(xb, (lp['wq'] * scale).astype(bf16),
                    preferred_element_type=f32) + lp['bq'] * scale
        k = jnp.dot(xb, lp['wk'].astype(bf16), preferred_element_type=f32) + lp['bk']
        v = jnp.dot(xb, lp['wv'].astype(bf16), preferred_element_type=f32) + lp['bv']
        ctxs = []
        for h in range(N_HEADS):
            sl = slice(h * HEAD_DIM, (h + 1) * HEAD_DIM)
            sc = jnp.einsum('bqd,bkd->bqk', q[..., sl].astype(bf16),
                            k[..., sl].astype(bf16), preferred_element_type=f32) + bias
            p = jax.nn.softmax(sc, axis=-1)
            ctxs.append(jnp.einsum('bqk,bkd->bqd', p.astype(bf16),
                                   v[..., sl].astype(bf16), preferred_element_type=f32))
        ctx = jnp.concatenate(ctxs, axis=-1)
        attn = jnp.dot(ctx.astype(bf16), lp['wo'].astype(bf16),
                       preferred_element_type=f32) + lp['bo']
        h1 = _layernorm(x + attn, lp['g1'], lp['be1'])
        ff = jnp.dot(h1.astype(bf16), lp['wi'].astype(bf16),
                     preferred_element_type=f32) + lp['bi']
        ff = _gelu_exact(ff)
        ff = jnp.dot(ff.astype(bf16), lp['wo2'].astype(bf16),
                     preferred_element_type=f32) + lp['bo2']
        x = _layernorm(h1 + ff, lp['g2'], lp['be2'])
    denom = jnp.maximum(jnp.sum(am, axis=1, keepdims=True), 1e-9)
    mean = jnp.sum(x * am[:, :, None], axis=1) / denom
    z = jnp.maximum(jnp.dot(mean.astype(bf16), params['head_w1'].astype(bf16),
                            preferred_element_type=f32), 0.0)
    z = jnp.dot(z.astype(bf16), params['head_w2'].astype(bf16),
                preferred_element_type=f32)
    feat = z / jnp.maximum(jnp.sqrt(jnp.sum(z * z, axis=1, keepdims=True)), NORM_EPS)
    return mean, feat


# --------------------------------- main ---------------------------------------
if __name__ == "__main__":
    key = jax.random.PRNGKey(0)
    k_param, k_ids = jax.random.split(key)
    params = init_params(k_param)
    packed = pack_params(params)

    B, PAIR, S = 2, 2, 8
    input_ids = jax.random.randint(k_ids, (B, PAIR, S), 0, VOCAB, dtype=jnp.int32)
    lengths = jnp.array([[8, 6], [7, 5]], jnp.int32)
    attention_mask = (jnp.arange(S)[None, None, :] < lengths[:, :, None]).astype(jnp.int32)

    fwd = jax.jit(dnabert_s_forward)
    feat1, feat2, mean1, mean2 = fwd(params, packed, input_ids, attention_mask)
    jax.block_until_ready((feat1, feat2, mean1, mean2))

    assert feat1.shape == (B, FEAT_DIM) and feat2.shape == (B, FEAT_DIM)
    assert mean1.shape == (B, HIDDEN) and mean2.shape == (B, HIDDEN)

    # correctness check against an unfused plain-JAX reference.
    # tolerance 3e-3: the kernel uses EUP approximate reciprocals for the softmax
    # and pooling denominators (the reference divides exactly); bf16 MXU operand
    # casts are mirrored in the reference.
    ids_st = jnp.concatenate([input_ids[:, 0], input_ids[:, 1]], axis=0)
    am_st = jnp.concatenate([attention_mask[:, 0], attention_mask[:, 1]],
                            axis=0).astype(jnp.float32)
    mean_ref, feat_ref = _reference_encode_pool_head(params, ids_st, am_st)
    mean_k = jnp.concatenate([mean1, mean2], axis=0)
    feat_k = jnp.concatenate([feat1, feat2], axis=0)
    assert jnp.allclose(mean_k, mean_ref, atol=3e-3, rtol=3e-3)
    assert jnp.allclose(feat_k, feat_ref, atol=3e-3, rtol=3e-3)
    assert bool(jnp.all(jnp.isfinite(feat_k)) and jnp.all(jnp.isfinite(mean_k)))

    # evaluate path (task_type='evaluate')
    emb_eval = jax.jit(get_mean_embeddings)(params, packed, input_ids[:, 0],
                                            attention_mask[:, 0])
    jax.block_until_ready(emb_eval)
    assert emb_eval.shape == (B, HIDDEN)
    assert jnp.allclose(emb_eval, mean1, atol=1e-3, rtol=1e-3)

    print("KERNEL_OK")
</pallas_src>

<mosaic_0001>
module attributes {stable_mosaic.version = 11 : i64} {
  func.func @_fused_forward_kernel(%arg0: memref<4x8x32xf32, #tpu.memory_space<vmem>>, %arg1: memref<4x8xf32, #tpu.memory_space<vmem>>, %arg2: memref<32x32xf32, #tpu.memory_space<vmem>>, %arg3: memref<384x96xbf16, #tpu.memory_space<vmem>>, %arg4: memref<18x96xf32, #tpu.memory_space<vmem>>, %arg5: memref<4x128xf32, #tpu.memory_space<vmem>>) attributes {dimension_semantics = [], scalar_prefetch = 0 : i64, scratch_operands = 0 : i64, tpu.core_type = #tpu.core_type<tc>} {
    %c0 = arith.constant 0 : index
    %c0_0 = arith.constant 0 : index
    %0 = vector.load %arg1[%c0, %c0_0] : memref<4x8xf32, #tpu.memory_space<vmem>>, vector<4x8xf32>
    %c0_1 = arith.constant 0 : index
    %c0_2 = arith.constant 0 : index
    %1 = vector.load %arg2[%c0_1, %c0_2] : memref<32x32xf32, #tpu.memory_space<vmem>>, vector<32x32xf32>
    %c0_3 = arith.constant 0 : index
    %c0_4 = arith.constant 0 : index
    %c0_5 = arith.constant 0 : index
    %2 = vector.load %arg0[%c0_3, %c0_4, %c0_5] : memref<4x8x32xf32, #tpu.memory_space<vmem>>, vector<4x8x32xf32>
    %3 = vector.shape_cast %2 : vector<4x8x32xf32> to vector<32x32xf32>
    %c0_6 = arith.constant 0 : index
    %c0_7 = arith.constant 0 : index
    %4 = vector.load %arg4[%c0_6, %c0_7] : memref<18x96xf32, #tpu.memory_space<vmem>>, vector<1x32xf32>
    %c1 = arith.constant 1 : index
    %c0_8 = arith.constant 0 : index
    %5 = vector.load %arg4[%c1, %c0_8] : memref<18x96xf32, #tpu.memory_space<vmem>>, vector<1x32xf32>
    %cst = arith.constant dense<0.000000e+00> : vector<32xf32>
    %6 = vector.multi_reduction <add>, %3, %cst [1] : vector<32x32xf32> to vector<32xf32>
    %7 = vector.shape_cast %6 : vector<32xf32> to vector<32x1xf32>
    %cst_9 = arith.constant 3.200000e+01 : f32
    %8 = vector.broadcast %cst_9 : f32 to vector<32x1xf32>
    %9 = arith.divf %7, %8 : vector<32x1xf32>
    %10 = vector.broadcast %9 : vector<32x1xf32> to vector<32x32xf32>
    %11 = arith.subf %3, %10 : vector<32x32xf32>
    %12 = vector.broadcast %9 : vector<32x1xf32> to vector<32x32xf32>
    %13 = arith.subf %3, %12 : vector<32x32xf32>
    %14 = arith.mulf %11, %13 : vector<32x32xf32>
    %cst_10 = arith.constant dense<0.000000e+00> : vector<32xf32>
    %15 = vector.multi_reduction <add>, %14, %cst_10 [1] : vector<32x32xf32> to vector<32xf32>
    %16 = vector.shape_cast %15 : vector<32xf32> to vector<32x1xf32>
    %cst_11 = arith.constant 3.200000e+01 : f32
    %17 = vector.broadcast %cst_11 : f32 to vector<32x1xf32>
    %18 = arith.divf %16, %17 : vector<32x1xf32>
    %19 = vector.broadcast %9 : vector<32x1xf32> to vector<32x32xf32>
    %20 = arith.subf %3, %19 : vector<32x32xf32>
    %cst_12 = arith.constant 9.99999996E-13 : f32
    %21 = vector.broadcast %cst_12 : f32 to vector<32x1xf32>
    %22 = arith.addf %18, %21 : vector<32x1xf32>
    %23 = math.rsqrt %22 : vector<32x1xf32>
    %24 = vector.broadcast %23 : vector<32x1xf32> to vector<32x32xf32>
    %25 = arith.mulf %20, %24 : vector<32x32xf32>
    %26 = vector.broadcast %4 : vector<1x32xf32> to vector<32x32xf32>
    %27 = arith.mulf %25, %26 : vector<32x32xf32>
    %28 = vector.broadcast %5 : vector<1x32xf32> to vector<32x32xf32>
    %29 = arith.addf %27, %28 : vector<32x32xf32>
    %c0_13 = arith.constant 0 : index
    %c0_14 = arith.constant 0 : index
    %30 = vector.load %arg3[%c0_13, %c0_14] : memref<384x96xbf16, #tpu.memory_space<vmem>>, vector<32x96xbf16>
    %c32 = arith.constant 32 : index
    %c0_15 = arith.constant 0 : index
    %31 = vector.load %arg3[%c32, %c0_15] : memref<384x96xbf16, #tpu.memory_space<vmem>>, vector<32x32xbf16>
    %c64 = arith.constant 64 : index
    %c0_16 = arith.constant 0 : index
    %32 = vector.load %arg3[%c64, %c0_16] : memref<384x96xbf16, #tpu.memory_space<vmem>>, vector<32x64xbf16>
    %c96 = arith.constant 96 : index
    %c0_17 = arith.constant 0 : index
    %33 = vector.load %arg3[%c96, %c0_17] : memref<384x96xbf16, #tpu.memory_space<vmem>>, vector<64x32xbf16>
    %c2 = arith.constant 2 : index
    %c0_18 = arith.constant 0 : index
    %34 = vector.load %arg4[%c2, %c0_18] : memref<18x96xf32, #tpu.memory_space<vmem>>, vector<1x96xf32>
    %c3 = arith.constant 3 : index
    %c0_19 = arith.constant 0 : index
    %35 = vector.load %arg4[%c3, %c0_19] : memref<18x96xf32, #tpu.memory_space<vmem>>, vector<1x32xf32>
    %c4 = arith.constant 4 : index
    %c0_20 = arith.constant 0 : index
    %36 = vector.load %arg4[%c4, %c0_20] : memref<18x96xf32, #tpu.memory_space<vmem>>, vector<1x32xf32>
    %c5 = arith.constant 5 : index
    %c0_21 = arith.constant 0 : index
    %37 = vector.load %arg4[%c5, %c0_21] : memref<18x96xf32, #tpu.memory_space<vmem>>, vector<1x32xf32>
    %c6 = arith.constant 6 : index
    %c0_22 = arith.constant 0 : index
    %38 = vector.load %arg4[%c6, %c0_22] : memref<18x96xf32, #tpu.memory_space<vmem>>, vector<1x64xf32>
    %c7 = arith.constant 7 : index
    %c0_23 = arith.constant 0 : index
    %39 = vector.load %arg4[%c7, %c0_23] : memref<18x96xf32, #tpu.memory_space<vmem>>, vector<1x32xf32>
    %c8 = arith.constant 8 : index
    %c0_24 = arith.constant 0 : index
    %40 = vector.load %arg4[%c8, %c0_24] : memref<18x96xf32, #tpu.memory_space<vmem>>, vector<1x32xf32>
    %c9 = arith.constant 9 : index
    %c0_25 = arith.constant 0 : index
    %41 = vector.load %arg4[%c9, %c0_25] : memref<18x96xf32, #tpu.memory_space<vmem>>, vector<1x32xf32>
    %42 = arith.truncf %29 : vector<32x32xf32> to vector<32x32xbf16>
    %cst_26 = arith.constant dense<0.000000e+00> : vector<32x96xf32>
    %43 = tpu.matmul %42, %30, %cst_26 {dimension_numbers = #tpu.dot_dimension_numbers<[1], [0], [0], [1], [0, 0, 1, 1], [], []>} : vector<32x32xbf16>, vector<32x96xbf16>, vector<32x96xf32> -> vector<32x96xf32>
    %44 = vector.broadcast %34 : vector<1x96xf32> to vector<32x96xf32>
    %45 = arith.addf %43, %44 : vector<32x96xf32>
    %46 = vector.extract_strided_slice %45 {offsets = [0, 0], sizes = [32, 16], strides = [1, 1]} : vector<32x96xf32> to vector<32x16xf32>
    %47 = arith.truncf %46 : vector<32x16xf32> to vector<32x16xbf16>
    %48 = vector.extract_strided_slice %45 {offsets = [0, 32], sizes = [32, 16], strides = [1, 1]} : vector<32x96xf32> to vector<32x16xf32>
    %49 = arith.truncf %48 : vector<32x16xf32> to vector<32x16xbf16>
    %50 = vector.extract_strided_slice %45 {offsets = [0, 64], sizes = [32, 16], strides = [1, 1]} : vector<32x96xf32> to vector<32x16xf32>
    %51 = arith.truncf %50 : vector<32x16xf32> to vector<32x16xbf16>
    "tpu.trace_start"() <{level = 10 : i32, message = "qd,kd->qk"}> : () -> ()
    %cst_27 = arith.constant dense<0.000000e+00> : vector<32x32xf32>
    %52 = tpu.matmul %47, %49, %cst_27 {dimension_numbers = #tpu.dot_dimension_numbers<[1], [1], [0], [0], [0, 0, 1, 0], [], []>} : vector<32x16xbf16>, vector<32x16xbf16>, vector<32x32xf32> -> vector<32x32xf32>
    "tpu.trace_stop"() : () -> ()
    %53 = arith.addf %52, %1 : vector<32x32xf32>
    %cst_28 = arith.constant dense<0xFF800000> : vector<32xf32>
    %54 = vector.multi_reduction <maximumf>, %53, %cst_28 [1] : vector<32x32xf32> to vector<32xf32>
    %55 = vector.shape_cast %54 : vector<32xf32> to vector<32x1xf32>
    %56 = vector.broadcast %55 : vector<32x1xf32> to vector<32x32xf32>
    %57 = arith.subf %53, %56 : vector<32x32xf32>
    %58 = math.exp %57 : vector<32x32xf32>
    %cst_29 = arith.constant dense<0.000000e+00> : vector<32xf32>
    %59 = vector.multi_reduction <add>, %58, %cst_29 [1] : vector<32x32xf32> to vector<32xf32>
    %60 = vector.shape_cast %59 : vector<32xf32> to vector<32x1xf32>
    %61 = tpu.reciprocal %60 {approx = true} : vector<32x1xf32> -> vector<32x1xf32>
    %62 = vector.broadcast %61 : vector<32x1xf32> to vector<32x32xf32>
    %63 = arith.mulf %58, %62 : vector<32x32xf32>
    %64 = arith.truncf %63 : vector<32x32xf32> to vector<32x32xbf16>
    %cst_30 = arith.constant dense<0.000000e+00> : vector<32x16xf32>
    %65 = tpu.matmul %64, %51, %cst_30 {dimension_numbers = #tpu.dot_dimension_numbers<[1], [0], [0], [1], [0, 0, 1, 1], [], []>} : vector<32x32xbf16>, vector<32x16xbf16>, vector<32x16xf32> -> vector<32x16xf32>
    %66 = vector.extract_strided_slice %45 {offsets = [0, 16], sizes = [32, 16], strides = [1, 1]} : vector<32x96xf32> to vector<32x16xf32>
    %67 = arith.truncf %66 : vector<32x16xf32> to vector<32x16xbf16>
    %68 = vector.extract_strided_slice %45 {offsets = [0, 48], sizes = [32, 16], strides = [1, 1]} : vector<32x96xf32> to vector<32x16xf32>
    %69 = arith.truncf %68 : vector<32x16xf32> to vector<32x16xbf16>
    %70 = vector.extract_strided_slice %45 {offsets = [0, 80], sizes = [32, 16], strides = [1, 1]} : vector<32x96xf32> to vector<32x16xf32>
    %71 = arith.truncf %70 : vector<32x16xf32> to vector<32x16xbf16>
    "tpu.trace_start"() <{level = 10 : i32, message = "qd,kd->qk"}> : () -> ()
    %cst_31 = arith.constant dense<0.000000e+00> : vector<32x32xf32>
    %72 = tpu.matmul %67, %69, %cst_31 {dimension_numbers = #tpu.dot_dimension_numbers<[1], [1], [0], [0], [0, 0, 1, 0], [], []>} : vector<32x16xbf16>, vector<32x16xbf16>, vector<32x32xf32> -> vector<32x32xf32>
    "tpu.trace_stop"() : () -> ()
    %73 = arith.addf %72, %1 : vector<32x32xf32>
    %cst_32 = arith.constant dense<0xFF800000> : vector<32xf32>
    %74 = vector.multi_reduction <maximumf>, %73, %cst_32 [1] : vector<32x32xf32> to vector<32xf32>
    %75 = vector.shape_cast %74 : vector<32xf32> to vector<32x1xf32>
    %76 = vector.broadcast %75 : vector<32x1xf32> to vector<32x32xf32>
    %77 = arith.subf %73, %76 : vector<32x32xf32>
    %78 = math.exp %77 : vector<32x32xf32>
    %cst_33 = arith.constant dense<0.000000e+00> : vector<32xf32>
    %79 = vector.multi_reduction <add>, %78, %cst_33 [1] : vector<32x32xf32> to vector<32xf32>
    %80 = vector.shape_cast %79 : vector<32xf32> to vector<32x1xf32>
    %81 = tpu.reciprocal %80 {approx = true} : vector<32x1xf32> -> vector<32x1xf32>
    %82 = vector.broadcast %81 : vector<32x1xf32> to vector<32x32xf32>
    %83 = arith.mulf %78, %82 : vector<32x32xf32>
    %84 = arith.truncf %83 : vector<32x32xf32> to vector<32x32xbf16>
    %cst_34 = arith.constant dense<0.000000e+00> : vector<32x16xf32>
    %85 = tpu.matmul %84, %71, %cst_34 {dimension_numbers = #tpu.dot_dimension_numbers<[1], [0], [0], [1], [0, 0, 1, 1], [], []>} : vector<32x32xbf16>, vector<32x16xbf16>, vector<32x16xf32> -> vector<32x16xf32>
    %86 = tpu.concatenate %65, %85 in 1 : vector<32x16xf32>, vector<32x16xf32> -> vector<32x32xf32>
    %87 = arith.truncf %86 : vector<32x32xf32> to vector<32x32xbf16>
    %cst_35 = arith.constant dense<0.000000e+00> : vector<32x32xf32>
    %88 = tpu.matmul %87, %31, %cst_35 {dimension_numbers = #tpu.dot_dimension_numbers<[1], [0], [0], [1], [0, 0, 1, 1], [], []>} : vector<32x32xbf16>, vector<32x32xbf16>, vector<32x32xf32> -> vector<32x32xf32>
    %89 = vector.broadcast %35 : vector<1x32xf32> to vector<32x32xf32>
    %90 = arith.addf %88, %89 : vector<32x32xf32>
    %91 = arith.addf %29, %90 : vector<32x32xf32>
    %cst_36 = arith.constant dense<0.000000e+00> : vector<32xf32>
    %92 = vector.multi_reduction <add>, %91, %cst_36 [1] : vector<32x32xf32> to vector<32xf32>
    %93 = vector.shape_cast %92 : vector<32xf32> to vector<32x1xf32>
    %cst_37 = arith.constant 3.200000e+01 : f32
    %94 = vector.broadcast %cst_37 : f32 to vector<32x1xf32>
    %95 = arith.divf %93, %94 : vector<32x1xf32>
    %96 = vector.broadcast %95 : vector<32x1xf32> to vector<32x32xf32>
    %97 = arith.subf %91, %96 : vector<32x32xf32>
    %98 = vector.broadcast %95 : vector<32x1xf32> to vector<32x32xf32>
    %99 = arith.subf %91, %98 : vector<32x32xf32>
    %100 = arith.mulf %97, %99 : vector<32x32xf32>
    %cst_38 = arith.constant dense<0.000000e+00> : vector<32xf32>
    %101 = vector.multi_reduction <add>, %100, %cst_38 [1] : vector<32x32xf32> to vector<32xf32>
    %102 = vector.shape_cast %101 : vector<32xf32> to vector<32x1xf32>
    %cst_39 = arith.constant 3.200000e+01 : f32
    %103 = vector.broadcast %cst_39 : f32 to vector<32x1xf32>
    %104 = arith.divf %102, %103 : vector<32x1xf32>
    %105 = vector.broadcast %95 : vector<32x1xf32> to vector<32x32xf32>
    %106 = arith.subf %91, %105 : vector<32x32xf32>
    %cst_40 = arith.constant 9.99999996E-13 : f32
    %107 = vector.broadcast %cst_40 : f32 to vector<32x1xf32>
    %108 = arith.addf %104, %107 : vector<32x1xf32>
    %109 = math.rsqrt %108 : vector<32x1xf32>
    %110 = vector.broadcast %109 : vector<32x1xf32> to vector<32x32xf32>
    %111 = arith.mulf %106, %110 : vector<32x32xf32>
    %112 = vector.broadcast %36 : vector<1x32xf32> to vector<32x32xf32>
    %113 = arith.mulf %111, %112 : vector<32x32xf32>
    %114 = vector.broadcast %37 : vector<1x32xf32> to vector<32x32xf32>
    %115 = arith.addf %113, %114 : vector<32x32xf32>
    %116 = arith.truncf %115 : vector<32x32xf32> to vector<32x32xbf16>
    %cst_41 = arith.constant dense<0.000000e+00> : vector<32x64xf32>
    %117 = tpu.matmul %116, %32, %cst_41 {dimension_numbers = #tpu.dot_dimension_numbers<[1], [0], [0], [1], [0, 0, 1, 1], [], []>} : vector<32x32xbf16>, vector<32x64xbf16>, vector<32x64xf32> -> vector<32x64xf32>
    %118 = vector.broadcast %38 : vector<1x64xf32> to vector<32x64xf32>
    %119 = arith.addf %117, %118 : vector<32x64xf32>
    %cst_42 = arith.constant 5.000000e-01 : f32
    %120 = vector.broadcast %cst_42 : f32 to vector<32x64xf32>
    %121 = arith.mulf %120, %119 : vector<32x64xf32>
    %cst_43 = arith.constant 0.707106769 : f32
    %122 = vector.broadcast %cst_43 : f32 to vector<32x64xf32>
    %123 = arith.mulf %119, %122 : vector<32x64xf32>
    %cst_44 = arith.constant 0.000000e+00 : f32
    %124 = vector.broadcast %cst_44 : f32 to vector<32x64xf32>
    %125 = arith.cmpf oge, %123, %124 : vector<32x64xf32>
    %cst_45 = arith.constant 0.000000e+00 : f32
    %126 = vector.broadcast %cst_45 : f32 to vector<32x64xf32>
    %127 = arith.subf %126, %123 : vector<32x64xf32>
    %128 = arith.select %125, %123, %127 : vector<32x64xi1>, vector<32x64xf32>
    %cst_46 = arith.constant 0.327591091 : f32
    %129 = vector.broadcast %cst_46 : f32 to vector<32x64xf32>
    %130 = arith.mulf %129, %128 : vector<32x64xf32>
    %cst_47 = arith.constant 1.000000e+00 : f32
    %131 = vector.broadcast %cst_47 : f32 to vector<32x64xf32>
    %132 = arith.addf %131, %130 : vector<32x64xf32>
    %cst_48 = arith.constant 1.000000e+00 : f32
    %133 = vector.broadcast %cst_48 : f32 to vector<32x64xf32>
    %134 = arith.divf %133, %132 : vector<32x64xf32>
    %cst_49 = arith.constant 1.06140542 : f32
    %135 = vector.broadcast %cst_49 : f32 to vector<32x64xf32>
    %136 = arith.mulf %135, %134 : vector<32x64xf32>
    %cst_50 = arith.constant -1.45315206 : f32
    %137 = vector.broadcast %cst_50 : f32 to vector<32x64xf32>
    %138 = arith.addf %136, %137 : vector<32x64xf32>
    %139 = arith.mulf %138, %134 : vector<32x64xf32>
    %cst_51 = arith.constant 1.42141378 : f32
    %140 = vector.broadcast %cst_51 : f32 to vector<32x64xf32>
    %141 = arith.addf %139, %140 : vector<32x64xf32>
    %142 = arith.mulf %141, %134 : vector<32x64xf32>
    %cst_52 = arith.constant -0.284496725 : f32
    %143 = vector.broadcast %cst_52 : f32 to vector<32x64xf32>
    %144 = arith.addf %142, %143 : vector<32x64xf32>
    %145 = arith.mulf %144, %134 : vector<32x64xf32>
    %cst_53 = arith.constant 0.254829586 : f32
    %146 = vector.broadcast %cst_53 : f32 to vector<32x64xf32>
    %147 = arith.addf %145, %146 : vector<32x64xf32>
    %148 = arith.mulf %147, %134 : vector<32x64xf32>
    %149 = arith.mulf %128, %128 : vector<32x64xf32>
    %cst_54 = arith.constant 0.000000e+00 : f32
    %150 = vector.broadcast %cst_54 : f32 to vector<32x64xf32>
    %151 = arith.subf %150, %149 : vector<32x64xf32>
    %152 = math.exp %151 : vector<32x64xf32>
    %153 = arith.mulf %148, %152 : vector<32x64xf32>
    %cst_55 = arith.constant 1.000000e+00 : f32
    %154 = vector.broadcast %cst_55 : f32 to vector<32x64xf32>
    %155 = arith.subf %154, %153 : vector<32x64xf32>
    %cst_56 = arith.constant 0.000000e+00 : f32
    %156 = vector.broadcast %cst_56 : f32 to vector<32x64xf32>
    %157 = arith.cmpf oge, %123, %156 : vector<32x64xf32>
    %cst_57 = arith.constant 0.000000e+00 : f32
    %158 = vector.broadcast %cst_57 : f32 to vector<32x64xf32>
    %159 = arith.subf %158, %155 : vector<32x64xf32>
    %160 = arith.select %157, %155, %159 : vector<32x64xi1>, vector<32x64xf32>
    %cst_58 = arith.constant 1.000000e+00 : f32
    %161 = vector.broadcast %cst_58 : f32 to vector<32x64xf32>
    %162 = arith.addf %161, %160 : vector<32x64xf32>
    %163 = arith.mulf %121, %162 : vector<32x64xf32>
    %164 = arith.truncf %163 : vector<32x64xf32> to vector<32x64xbf16>
    %cst_59 = arith.constant dense<0.000000e+00> : vector<32x32xf32>
    %165 = tpu.matmul %164, %33, %cst_59 {dimension_numbers = #tpu.dot_dimension_numbers<[1], [0], [0], [1], [0, 0, 1, 1], [], []>} : vector<32x64xbf16>, vector<64x32xbf16>, vector<32x32xf32> -> vector<32x32xf32>
    %166 = vector.broadcast %39 : vector<1x32xf32> to vector<32x32xf32>
    %167 = arith.addf %165, %166 : vector<32x32xf32>
    %168 = arith.addf %115, %167 : vector<32x32xf32>
    %cst_60 = arith.constant dense<0.000000e+00> : vector<32xf32>
    %169 = vector.multi_reduction <add>, %168, %cst_60 [1] : vector<32x32xf32> to vector<32xf32>
    %170 = vector.shape_cast %169 : vector<32xf32> to vector<32x1xf32>
    %cst_61 = arith.constant 3.200000e+01 : f32
    %171 = vector.broadcast %cst_61 : f32 to vector<32x1xf32>
    %172 = arith.divf %170, %171 : vector<32x1xf32>
    %173 = vector.broadcast %172 : vector<32x1xf32> to vector<32x32xf32>
    %174 = arith.subf %168, %173 : vector<32x32xf32>
    %175 = vector.broadcast %172 : vector<32x1xf32> to vector<32x32xf32>
    %176 = arith.subf %168, %175 : vector<32x32xf32>
    %177 = arith.mulf %174, %176 : vector<32x32xf32>
    %cst_62 = arith.constant dense<0.000000e+00> : vector<32xf32>
    %178 = vector.multi_reduction <add>, %177, %cst_62 [1] : vector<32x32xf32> to vector<32xf32>
    %179 = vector.shape_cast %178 : vector<32xf32> to vector<32x1xf32>
    %cst_63 = arith.constant 3.200000e+01 : f32
    %180 = vector.broadcast %cst_63 : f32 to vector<32x1xf32>
    %181 = arith.divf %179, %180 : vector<32x1xf32>
    %182 = vector.broadcast %172 : vector<32x1xf32> to vector<32x32xf32>
    %183 = arith.subf %168, %182 : vector<32x32xf32>
    %cst_64 = arith.constant 9.99999996E-13 : f32
    %184 = vector.broadcast %cst_64 : f32 to vector<32x1xf32>
    %185 = arith.addf %181, %184 : vector<32x1xf32>
    %186 = math.rsqrt %185 : vector<32x1xf32>
    %187 = vector.broadcast %186 : vector<32x1xf32> to vector<32x32xf32>
    %188 = arith.mulf %183, %187 : vector<32x32xf32>
    %189 = vector.broadcast %40 : vector<1x32xf32> to vector<32x32xf32>
    %190 = arith.mulf %188, %189 : vector<32x32xf32>
    %191 = vector.broadcast %41 : vector<1x32xf32> to vector<32x32xf32>
    %192 = arith.addf %190, %191 : vector<32x32xf32>
    %c160 = arith.constant 160 : index
    %c0_65 = arith.constant 0 : index
    %193 = vector.load %arg3[%c160, %c0_65] : memref<384x96xbf16, #tpu.memory_space<vmem>>, vector<32x96xbf16>
    %c192 = arith.constant 192 : index
    %c0_66 = arith.constant 0 : index
    %194 = vector.load %arg3[%c192, %c0_66] : memref<384x96xbf16, #tpu.memory_space<vmem>>, vector<32x32xbf16>
    %c224 = arith.constant 224 : index
    %c0_67 = arith.constant 0 : index
    %195 = vector.load %arg3[%c224, %c0_67] : memref<384x96xbf16, #tpu.memory_space<vmem>>, vector<32x64xbf16>
    %c256 = arith.constant 256 : index
    %c0_68 = arith.constant 0 : index
    %196 = vector.load %arg3[%c256, %c0_68] : memref<384x96xbf16, #tpu.memory_space<vmem>>, vector<64x32xbf16>
    %c10 = arith.constant 10 : index
    %c0_69 = arith.constant 0 : index
    %197 = vector.load %arg4[%c10, %c0_69] : memref<18x96xf32, #tpu.memory_space<vmem>>, vector<1x96xf32>
    %c11 = arith.constant 11 : index
    %c0_70 = arith.constant 0 : index
    %198 = vector.load %arg4[%c11, %c0_70] : memref<18x96xf32, #tpu.memory_space<vmem>>, vector<1x32xf32>
    %c12 = arith.constant 12 : index
    %c0_71 = arith.constant 0 : index
    %199 = vector.load %arg4[%c12, %c0_71] : memref<18x96xf32, #tpu.memory_space<vmem>>, vector<1x32xf32>
    %c13 = arith.constant 13 : index
    %c0_72 = arith.constant 0 : index
    %200 = vector.load %arg4[%c13, %c0_72] : memref<18x96xf32, #tpu.memory_space<vmem>>, vector<1x32xf32>
    %c14 = arith.constant 14 : index
    %c0_73 = arith.constant 0 : index
    %201 = vector.load %arg4[%c14, %c0_73] : memref<18x96xf32, #tpu.memory_space<vmem>>, vector<1x64xf32>
    %c15 = arith.constant 15 : index
    %c0_74 = arith.constant 0 : index
    %202 = vector.load %arg4[%c15, %c0_74] : memref<18x96xf32, #tpu.memory_space<vmem>>, vector<1x32xf32>
    %c16 = arith.constant 16 : index
    %c0_75 = arith.constant 0 : index
    %203 = vector.load %arg4[%c16, %c0_75] : memref<18x96xf32, #tpu.memory_space<vmem>>, vector<1x32xf32>
    %c17 = arith.constant 17 : index
    %c0_76 = arith.constant 0 : index
    %204 = vector.load %arg4[%c17, %c0_76] : memref<18x96xf32, #tpu.memory_space<vmem>>, vector<1x32xf32>
    %205 = arith.truncf %192 : vector<32x32xf32> to vector<32x32xbf16>
    %cst_77 = arith.constant dense<0.000000e+00> : vector<32x96xf32>
    %206 = tpu.matmul %205, %193, %cst_77 {dimension_numbers = #tpu.dot_dimension_numbers<[1], [0], [0], [1], [0, 0, 1, 1], [], []>} : vector<32x32xbf16>, vector<32x96xbf16>, vector<32x96xf32> -> vector<32x96xf32>
    %207 = vector.broadcast %197 : vector<1x96xf32> to vector<32x96xf32>
    %208 = arith.addf %206, %207 : vector<32x96xf32>
    %209 = vector.extract_strided_slice %208 {offsets = [0, 0], sizes = [32, 16], strides = [1, 1]} : vector<32x96xf32> to vector<32x16xf32>
    %210 = arith.truncf %209 : vector<32x16xf32> to vector<32x16xbf16>
    %211 = vector.extract_strided_slice %208 {offsets = [0, 32], sizes = [32, 16], strides = [1, 1]} : vector<32x96xf32> to vector<32x16xf32>
    %212 = arith.truncf %211 : vector<32x16xf32> to vector<32x16xbf16>
    %213 = vector.extract_strided_slice %208 {offsets = [0, 64], sizes = [32, 16], strides = [1, 1]} : vector<32x96xf32> to vector<32x16xf32>
    %214 = arith.truncf %213 : vector<32x16xf32> to vector<32x16xbf16>
    "tpu.trace_start"() <{level = 10 : i32, message = "qd,kd->qk"}> : () -> ()
    %cst_78 = arith.constant dense<0.000000e+00> : vector<32x32xf32>
    %215 = tpu.matmul %210, %212, %cst_78 {dimension_numbers = #tpu.dot_dimension_numbers<[1], [1], [0], [0], [0, 0, 1, 0], [], []>} : vector<32x16xbf16>, vector<32x16xbf16>, vector<32x32xf32> -> vector<32x32xf32>
    "tpu.trace_stop"() : () -> ()
    %216 = arith.addf %215, %1 : vector<32x32xf32>
    %cst_79 = arith.constant dense<0xFF800000> : vector<32xf32>
    %217 = vector.multi_reduction <maximumf>, %216, %cst_79 [1] : vector<32x32xf32> to vector<32xf32>
    %218 = vector.shape_cast %217 : vector<32xf32> to vector<32x1xf32>
    %219 = vector.broadcast %218 : vector<32x1xf32> to vector<32x32xf32>
    %220 = arith.subf %216, %219 : vector<32x32xf32>
    %221 = math.exp %220 : vector<32x32xf32>
    %cst_80 = arith.constant dense<0.000000e+00> : vector<32xf32>
    %222 = vector.multi_reduction <add>, %221, %cst_80 [1] : vector<32x32xf32> to vector<32xf32>
    %223 = vector.shape_cast %222 : vector<32xf32> to vector<32x1xf32>
    %224 = tpu.reciprocal %223 {approx = true} : vector<32x1xf32> -> vector<32x1xf32>
    %225 = vector.broadcast %224 : vector<32x1xf32> to vector<32x32xf32>
    %226 = arith.mulf %221, %225 : vector<32x32xf32>
    %227 = arith.truncf %226 : vector<32x32xf32> to vector<32x32xbf16>
    %cst_81 = arith.constant dense<0.000000e+00> : vector<32x16xf32>
    %228 = tpu.matmul %227, %214, %cst_81 {dimension_numbers = #tpu.dot_dimension_numbers<[1], [0], [0], [1], [0, 0, 1, 1], [], []>} : vector<32x32xbf16>, vector<32x16xbf16>, vector<32x16xf32> -> vector<32x16xf32>
    %229 = vector.extract_strided_slice %208 {offsets = [0, 16], sizes = [32, 16], strides = [1, 1]} : vector<32x96xf32> to vector<32x16xf32>
    %230 = arith.truncf %229 : vector<32x16xf32> to vector<32x16xbf16>
    %231 = vector.extract_strided_slice %208 {offsets = [0, 48], sizes = [32, 16], strides = [1, 1]} : vector<32x96xf32> to vector<32x16xf32>
    %232 = arith.truncf %231 : vector<32x16xf32> to vector<32x16xbf16>
    %233 = vector.extract_strided_slice %208 {offsets = [0, 80], sizes = [32, 16], strides = [1, 1]} : vector<32x96xf32> to vector<32x16xf32>
    %234 = arith.truncf %233 : vector<32x16xf32> to vector<32x16xbf16>
    "tpu.trace_start"() <{level = 10 : i32, message = "qd,kd->qk"}> : () -> ()
    %cst_82 = arith.constant dense<0.000000e+00> : vector<32x32xf32>
    %235 = tpu.matmul %230, %232, %cst_82 {dimension_numbers = #tpu.dot_dimension_numbers<[1], [1], [0], [0], [0, 0, 1, 0], [], []>} : vector<32x16xbf16>, vector<32x16xbf16>, vector<32x32xf32> -> vector<32x32xf32>
    "tpu.trace_stop"() : () -> ()
    %236 = arith.addf %235, %1 : vector<32x32xf32>
    %cst_83 = arith.constant dense<0xFF800000> : vector<32xf32>
    %237 = vector.multi_reduction <maximumf>, %236, %cst_83 [1] : vector<32x32xf32> to vector<32xf32>
    %238 = vector.shape_cast %237 : vector<32xf32> to vector<32x1xf32>
    %239 = vector.broadcast %238 : vector<32x1xf32> to vector<32x32xf32>
    %240 = arith.subf %236, %239 : vector<32x32xf32>
    %241 = math.exp %240 : vector<32x32xf32>
    %cst_84 = arith.constant dense<0.000000e+00> : vector<32xf32>
    %242 = vector.multi_reduction <add>, %241, %cst_84 [1] : vector<32x32xf32> to vector<32xf32>
    %243 = vector.shape_cast %242 : vector<32xf32> to vector<32x1xf32>
    %244 = tpu.reciprocal %243 {approx = true} : vector<32x1xf32> -> vector<32x1xf32>
    %245 = vector.broadcast %244 : vector<32x1xf32> to vector<32x32xf32>
    %246 = arith.mulf %241, %245 : vector<32x32xf32>
    %247 = arith.truncf %246 : vector<32x32xf32> to vector<32x32xbf16>
    %cst_85 = arith.constant dense<0.000000e+00> : vector<32x16xf32>
    %248 = tpu.matmul %247, %234, %cst_85 {dimension_numbers = #tpu.dot_dimension_numbers<[1], [0], [0], [1], [0, 0, 1, 1], [], []>} : vector<32x32xbf16>, vector<32x16xbf16>, vector<32x16xf32> -> vector<32x16xf32>
    %249 = tpu.concatenate %228, %248 in 1 : vector<32x16xf32>, vector<32x16xf32> -> vector<32x32xf32>
    %250 = arith.truncf %249 : vector<32x32xf32> to vector<32x32xbf16>
    %cst_86 = arith.constant dense<0.000000e+00> : vector<32x32xf32>
    %251 = tpu.matmul %250, %194, %cst_86 {dimension_numbers = #tpu.dot_dimension_numbers<[1], [0], [0], [1], [0, 0, 1, 1], [], []>} : vector<32x32xbf16>, vector<32x32xbf16>, vector<32x32xf32> -> vector<32x32xf32>
    %252 = vector.broadcast %198 : vector<1x32xf32> to vector<32x32xf32>
    %253 = arith.addf %251, %252 : vector<32x32xf32>
    %254 = arith.addf %192, %253 : vector<32x32xf32>
    %cst_87 = arith.constant dense<0.000000e+00> : vector<32xf32>
    %255 = vector.multi_reduction <add>, %254, %cst_87 [1] : vector<32x32xf32> to vector<32xf32>
    %256 = vector.shape_cast %255 : vector<32xf32> to vector<32x1xf32>
    %cst_88 = arith.constant 3.200000e+01 : f32
    %257 = vector.broadcast %cst_88 : f32 to vector<32x1xf32>
    %258 = arith.divf %256, %257 : vector<32x1xf32>
    %259 = vector.broadcast %258 : vector<32x1xf32> to vector<32x32xf32>
    %260 = arith.subf %254, %259 : vector<32x32xf32>
    %261 = vector.broadcast %258 : vector<32x1xf32> to vector<32x32xf32>
    %262 = arith.subf %254, %261 : vector<32x32xf32>
    %263 = arith.mulf %260, %262 : vector<32x32xf32>
    %cst_89 = arith.constant dense<0.000000e+00> : vector<32xf32>
    %264 = vector.multi_reduction <add>, %263, %cst_89 [1] : vector<32x32xf32> to vector<32xf32>
    %265 = vector.shape_cast %264 : vector<32xf32> to vector<32x1xf32>
    %cst_90 = arith.constant 3.200000e+01 : f32
    %266 = vector.broadcast %cst_90 : f32 to vector<32x1xf32>
    %267 = arith.divf %265, %266 : vector<32x1xf32>
    %268 = vector.broadcast %258 : vector<32x1xf32> to vector<32x32xf32>
    %269 = arith.subf %254, %268 : vector<32x32xf32>
    %cst_91 = arith.constant 9.99999996E-13 : f32
    %270 = vector.broadcast %cst_91 : f32 to vector<32x1xf32>
    %271 = arith.addf %267, %270 : vector<32x1xf32>
    %272 = math.rsqrt %271 : vector<32x1xf32>
    %273 = vector.broadcast %272 : vector<32x1xf32> to vector<32x32xf32>
    %274 = arith.mulf %269, %273 : vector<32x32xf32>
    %275 = vector.broadcast %199 : vector<1x32xf32> to vector<32x32xf32>
    %276 = arith.mulf %274, %275 : vector<32x32xf32>
    %277 = vector.broadcast %200 : vector<1x32xf32> to vector<32x32xf32>
    %278 = arith.addf %276, %277 : vector<32x32xf32>
    %279 = arith.truncf %278 : vector<32x32xf32> to vector<32x32xbf16>
    %cst_92 = arith.constant dense<0.000000e+00> : vector<32x64xf32>
    %280 = tpu.matmul %279, %195, %cst_92 {dimension_numbers = #tpu.dot_dimension_numbers<[1], [0], [0], [1], [0, 0, 1, 1], [], []>} : vector<32x32xbf16>, vector<32x64xbf16>, vector<32x64xf32> -> vector<32x64xf32>
    %281 = vector.broadcast %201 : vector<1x64xf32> to vector<32x64xf32>
    %282 = arith.addf %280, %281 : vector<32x64xf32>
    %cst_93 = arith.constant 5.000000e-01 : f32
    %283 = vector.broadcast %cst_93 : f32 to vector<32x64xf32>
    %284 = arith.mulf %283, %282 : vector<32x64xf32>
    %cst_94 = arith.constant 0.707106769 : f32
    %285 = vector.broadcast %cst_94 : f32 to vector<32x64xf32>
    %286 = arith.mulf %282, %285 : vector<32x64xf32>
    %cst_95 = arith.constant 0.000000e+00 : f32
    %287 = vector.broadcast %cst_95 : f32 to vector<32x64xf32>
    %288 = arith.cmpf oge, %286, %287 : vector<32x64xf32>
    %cst_96 = arith.constant 0.000000e+00 : f32
    %289 = vector.broadcast %cst_96 : f32 to vector<32x64xf32>
    %290 = arith.subf %289, %286 : vector<32x64xf32>
    %291 = arith.select %288, %286, %290 : vector<32x64xi1>, vector<32x64xf32>
    %cst_97 = arith.constant 0.327591091 : f32
    %292 = vector.broadcast %cst_97 : f32 to vector<32x64xf32>
    %293 = arith.mulf %292, %291 : vector<32x64xf32>
    %cst_98 = arith.constant 1.000000e+00 : f32
    %294 = vector.broadcast %cst_98 : f32 to vector<32x64xf32>
    %295 = arith.addf %294, %293 : vector<32x64xf32>
    %cst_99 = arith.constant 1.000000e+00 : f32
    %296 = vector.broadcast %cst_99 : f32 to vector<32x64xf32>
    %297 = arith.divf %296, %295 : vector<32x64xf32>
    %cst_100 = arith.constant 1.06140542 : f32
    %298 = vector.broadcast %cst_100 : f32 to vector<32x64xf32>
    %299 = arith.mulf %298, %297 : vector<32x64xf32>
    %cst_101 = arith.constant -1.45315206 : f32
    %300 = vector.broadcast %cst_101 : f32 to vector<32x64xf32>
    %301 = arith.addf %299, %300 : vector<32x64xf32>
    %302 = arith.mulf %301, %297 : vector<32x64xf32>
    %cst_102 = arith.constant 1.42141378 : f32
    %303 = vector.broadcast %cst_102 : f32 to vector<32x64xf32>
    %304 = arith.addf %302, %303 : vector<32x64xf32>
    %305 = arith.mulf %304, %297 : vector<32x64xf32>
    %cst_103 = arith.constant -0.284496725 : f32
    %306 = vector.broadcast %cst_103 : f32 to vector<32x64xf32>
    %307 = arith.addf %305, %306 : vector<32x64xf32>
    %308 = arith.mulf %307, %297 : vector<32x64xf32>
    %cst_104 = arith.constant 0.254829586 : f32
    %309 = vector.broadcast %cst_104 : f32 to vector<32x64xf32>
    %310 = arith.addf %308, %309 : vector<32x64xf32>
    %311 = arith.mulf %310, %297 : vector<32x64xf32>
    %312 = arith.mulf %291, %291 : vector<32x64xf32>
    %cst_105 = arith.constant 0.000000e+00 : f32
    %313 = vector.broadcast %cst_105 : f32 to vector<32x64xf32>
    %314 = arith.subf %313, %312 : vector<32x64xf32>
    %315 = math.exp %314 : vector<32x64xf32>
    %316 = arith.mulf %311, %315 : vector<32x64xf32>
    %cst_106 = arith.constant 1.000000e+00 : f32
    %317 = vector.broadcast %cst_106 : f32 to vector<32x64xf32>
    %318 = arith.subf %317, %316 : vector<32x64xf32>
    %cst_107 = arith.constant 0.000000e+00 : f32
    %319 = vector.broadcast %cst_107 : f32 to vector<32x64xf32>
    %320 = arith.cmpf oge, %286, %319 : vector<32x64xf32>
    %cst_108 = arith.constant 0.000000e+00 : f32
    %321 = vector.broadcast %cst_108 : f32 to vector<32x64xf32>
    %322 = arith.subf %321, %318 : vector<32x64xf32>
    %323 = arith.select %320, %318, %322 : vector<32x64xi1>, vector<32x64xf32>
    %cst_109 = arith.constant 1.000000e+00 : f32
    %324 = vector.broadcast %cst_109 : f32 to vector<32x64xf32>
    %325 = arith.addf %324, %323 : vector<32x64xf32>
    %326 = arith.mulf %284, %325 : vector<32x64xf32>
    %327 = arith.truncf %326 : vector<32x64xf32> to vector<32x64xbf16>
    %cst_110 = arith.constant dense<0.000000e+00> : vector<32x32xf32>
    %328 = tpu.matmul %327, %196, %cst_110 {dimension_numbers = #tpu.dot_dimension_numbers<[1], [0], [0], [1], [0, 0, 1, 1], [], []>} : vector<32x64xbf16>, vector<64x32xbf16>, vector<32x32xf32> -> vector<32x32xf32>
    %329 = vector.broadcast %202 : vector<1x32xf32> to vector<32x32xf32>
    %330 = arith.addf %328, %329 : vector<32x32xf32>
    %331 = arith.addf %278, %330 : vector<32x32xf32>
    %cst_111 = arith.constant dense<0.000000e+00> : vector<32xf32>
    %332 = vector.multi_reduction <add>, %331, %cst_111 [1] : vector<32x32xf32> to vector<32xf32>
    %333 = vector.shape_cast %332 : vector<32xf32> to vector<32x1xf32>
    %cst_112 = arith.constant 3.200000e+01 : f32
    %334 = vector.broadcast %cst_112 : f32 to vector<32x1xf32>
    %335 = arith.divf %333, %334 : vector<32x1xf32>
    %336 = vector.broadcast %335 : vector<32x1xf32> to vector<32x32xf32>
    %337 = arith.subf %331, %336 : vector<32x32xf32>
    %338 = vector.broadcast %335 : vector<32x1xf32> to vector<32x32xf32>
    %339 = arith.subf %331, %338 : vector<32x32xf32>
    %340 = arith.mulf %337, %339 : vector<32x32xf32>
    %cst_113 = arith.constant dense<0.000000e+00> : vector<32xf32>
    %341 = vector.multi_reduction <add>, %340, %cst_113 [1] : vector<32x32xf32> to vector<32xf32>
    %342 = vector.shape_cast %341 : vector<32xf32> to vector<32x1xf32>
    %cst_114 = arith.constant 3.200000e+01 : f32
    %343 = vector.broadcast %cst_114 : f32 to vector<32x1xf32>
    %344 = arith.divf %342, %343 : vector<32x1xf32>
    %345 = vector.broadcast %335 : vector<32x1xf32> to vector<32x32xf32>
    %346 = arith.subf %331, %345 : vector<32x32xf32>
    %cst_115 = arith.constant 9.99999996E-13 : f32
    %347 = vector.broadcast %cst_115 : f32 to vector<32x1xf32>
    %348 = arith.addf %344, %347 : vector<32x1xf32>
    %349 = math.rsqrt %348 : vector<32x1xf32>
    %350 = vector.broadcast %349 : vector<32x1xf32> to vector<32x32xf32>
    %351 = arith.mulf %346, %350 : vector<32x32xf32>
    %352 = vector.broadcast %203 : vector<1x32xf32> to vector<32x32xf32>
    %353 = arith.mulf %351, %352 : vector<32x32xf32>
    %354 = vector.broadcast %204 : vector<1x32xf32> to vector<32x32xf32>
    %355 = arith.addf %353, %354 : vector<32x32xf32>
    %356 = vector.shape_cast %355 : vector<32x32xf32> to vector<4x8x32xf32>
    %cst_116 = arith.constant dense<0.000000e+00> : vector<4xf32>
    %357 = vector.multi_reduction <add>, %0, %cst_116 [1] : vector<4x8xf32> to vector<4xf32>
    %358 = vector.shape_cast %357 : vector<4xf32> to vector<4x1xf32>
    %cst_117 = arith.constant 9.99999971E-10 : f32
    %359 = vector.broadcast %cst_117 : f32 to vector<4x1xf32>
    %360 = arith.maximumf %358, %359 : vector<4x1xf32>
    %361 = vector.shape_cast %0 : vector<4x8xf32> to vector<4x8x1xf32>
    %362 = vector.broadcast %361 : vector<4x8x1xf32> to vector<4x8x32xf32>
    %363 = arith.mulf %356, %362 : vector<4x8x32xf32>
    %cst_118 = arith.constant dense<0.000000e+00> : vector<4x32xf32>
    %364 = vector.multi_reduction <add>, %363, %cst_118 [1] : vector<4x8x32xf32> to vector<4x32xf32>
    %365 = tpu.reciprocal %360 {approx = true} : vector<4x1xf32> -> vector<4x1xf32>
    %366 = vector.broadcast %365 : vector<4x1xf32> to vector<4x32xf32>
    %367 = arith.mulf %364, %366 : vector<4x32xf32>
    %c320 = arith.constant 320 : index
    %c0_119 = arith.constant 0 : index
    %368 = vector.load %arg3[%c320, %c0_119] : memref<384x96xbf16, #tpu.memory_space<vmem>>, vector<32x32xbf16>
    %c352 = arith.constant 352 : index
    %c0_120 = arith.constant 0 : index
    %369 = vector.load %arg3[%c352, %c0_120] : memref<384x96xbf16, #tpu.memory_space<vmem>>, vector<32x16xbf16>
    %370 = arith.truncf %367 : vector<4x32xf32> to vector<4x32xbf16>
    %cst_121 = arith.constant dense<0.000000e+00> : vector<4x32xf32>
    %371 = tpu.matmul %370, %368, %cst_121 {dimension_numbers = #tpu.dot_dimension_numbers<[1], [0], [0], [1], [0, 0, 1, 1], [], []>} : vector<4x32xbf16>, vector<32x32xbf16>, vector<4x32xf32> -> vector<4x32xf32>
    %cst_122 = arith.constant 0.000000e+00 : f32
    %372 = vector.broadcast %cst_122 : f32 to vector<4x32xf32>
    %373 = arith.maximumf %371, %372 : vector<4x32xf32>
    %374 = arith.truncf %373 : vector<4x32xf32> to vector<4x32xbf16>
    %cst_123 = arith.constant dense<0.000000e+00> : vector<4x16xf32>
    %375 = tpu.matmul %374, %369, %cst_123 {dimension_numbers = #tpu.dot_dimension_numbers<[1], [0], [0], [1], [0, 0, 1, 1], [], []>} : vector<4x32xbf16>, vector<32x16xbf16>, vector<4x16xf32> -> vector<4x16xf32>
    %376 = arith.mulf %375, %375 : vector<4x16xf32>
    %cst_124 = arith.constant dense<0.000000e+00> : vector<4xf32>
    %377 = vector.multi_reduction <add>, %376, %cst_124 [1] : vector<4x16xf32> to vector<4xf32>
    %378 = vector.shape_cast %377 : vector<4xf32> to vector<4x1xf32>
    %cst_125 = arith.constant 1.000000e-24 : f32
    %379 = vector.broadcast %cst_125 : f32 to vector<4x1xf32>
    %380 = arith.maximumf %378, %379 : vector<4x1xf32>
    %381 = math.rsqrt %380 : vector<4x1xf32>
    %382 = vector.broadcast %381 : vector<4x1xf32> to vector<4x16xf32>
    %383 = arith.mulf %375, %382 : vector<4x16xf32>
    %cst_126 = arith.constant 0.000000e+00 : f32
    %384 = vector.broadcast %cst_126 : f32 to vector<4x80xf32>
    %385 = tpu.concatenate %367, %383, %384 in 1 : vector<4x32xf32>, vector<4x16xf32>, vector<4x80xf32> -> vector<4x128xf32>
    %c0_127 = arith.constant 0 : index
    %c0_128 = arith.constant 0 : index
    %386 = vector.load %arg5[%c0_127, %c0_128] : memref<4x128xf32, #tpu.memory_space<vmem>>, vector<4x128xf32>
    tpu.vector_store %arg5[%c0_127, %c0_128], %385 {strides = array<i32>} : memref<4x128xf32, #tpu.memory_space<vmem>>, vector<4x128xf32>,
    return
  }
}

</mosaic_0001>

<bundles_post_ra>
// kernel: eq.8
= control target key start
LH: loop header
LB: loop body
LE: loop exit
PB: predicated region body
PF: predicated region fallthrough
CT: control target
= control target key end

     0   :  { %vm7_vm0 = vcmask 64512   ;;  %s37_s8 = smov 8   ;;  %s38_s9 = smov 16   ;;  %vm13_vm1 = vcmask 261312   ;;  %vm19_vm2 = vcmask 195712   ;;  %vm25_vm3 = vcmask 130112   ;;  %s55_s0 = inlined_call_operand.vmem [shape: s32[4,8], index: 0, kind: input, shape index: {}]   ;;  %s56_s1 = inlined_call_operand.vmem [shape: s32[32], index: 1, kind: output, shape index: {}]  }
   0x1   :  { %v4_v0 = vld [vmem:[%s55_s0] sm:$0xf]  ;;  %s36_s0 = smov 24  }
   0x2   :  { %5 = vst [vmem:[#allocation1] sm:$0xf] %v4_v0 }
   0x9   :  { %v10_v1 = vld [vmem:[#allocation1 + $0x3] sm:$0x1]   ;;  %v22_v2 = vld [vmem:[#allocation1 + $0x1] sm:$0x1]   ;;  %v6_v3 = vld [vmem:[#allocation1] sm:$0x1]  }
   0xa   :  { %11 = vrot.lane.b32.xlu0 %v10_v1, %s36_s0  ;;  %23 = vrot.lane.b32.xlu1 %v22_v2, %s37_s8  ;;  %v16_v4 = vld [vmem:[#allocation1 + $0x2] sm:$0x1]   ;;  %8 = vst.msk [vmem:[#allocation0] sm:$0x1] %vm7_vm0, %v6_v3  }
   0xe   :  { %17 = vrot.lane.b32.xlu0 %v16_v4, %s38_s9 }
  0x7c   :  { %v12_v5 = vpop.permute.xlu0 %11   ;;  %v24_v6 = vpop.permute.xlu1 %23  }
  0x7d   :  { %14 = vst.msk [vmem:[#allocation0] sm:$0x1] %vm13_vm1, %v12_v5  }
  0x80   :  { %v18_v7 = vpop.permute.xlu0 %17  }
  0x81   :  { %20 = vst.msk [vmem:[#allocation0] sm:$0x1] %vm19_vm2, %v18_v7  }
  0x82   :  { %26 = vst.msk [vmem:[#allocation0] sm:$0x1] %vm25_vm3, %v24_v6  }
  0x89   :  { %v30_v8 = vld [vmem:[#allocation0] sm:$0x1] }
  0x8a   :  { %32 = vst [vmem:[%s56_s1] sm:$0x1] %v30_v8 }

// kernel: dnabert_s_forward.1
= control target key start
LH: loop header
LB: loop body
LE: loop exit
PB: predicated region body
PF: predicated region fallthrough
CT: control target
= control target key end

     0   :  { %vm32_vm0 = vcmask 261120   ;;  %vm211_vm1 = vcmask 130048   ;;  %s2782_s10 = smov 96   ;;  %s2783_s19 = smov 64   ;;  %vm936_vm6 = vcmask 523264   ;;  %vm2024_vm11 = vcmask 60416   ;;  %s3436_s0 = inlined_call_operand.vmem [shape: f32[4,8,32], index: 0, kind: input, shape index: {}]   ;;  %s3437_s3 = inlined_call_operand.vmem [shape: bf16[384,96], index: 3, kind: input, shape index: {}]   ;;  %s3438_s4 = inlined_call_operand.vmem [shape: f32[18,96], index: 4, kind: input, shape index: {}]   ;;  %s3439_s2 = inlined_call_operand.vmem [shape: f32[32,32], index: 2, kind: input, shape index: {}]   ;;  %s3440_s1 = inlined_call_operand.vmem [shape: f32[4,8], index: 1, kind: input, shape index: {}]   ;;  %s3441_s5 = inlined_call_operand.vmem [shape: f32[4,128], index: 5, kind: output, shape index: {}]  }
   0x1   :  { %v26_v0 = vld [vmem:[%s3436_s0] sm:$0xff]  ;;  %v28_v1 = vld [vmem:[%s3436_s0 + $0x10] sm:$0xff]  ;;  %v27_v2 = vld [vmem:[%s3436_s0 + $0x8] sm:$0xff]  ;;  %s2784_s20 = smov 80   ;;  %s2785_s21 = smov 112   ;;  %vm2789_vm12 = vmmov 0  }
   0x2   :  { %v33_v3 = vsel %vm32_vm0, %v26_v0, 0.0  ;;  %v39_v4 = vsel %vm32_vm0, %v28_v1, 0.0  ;;  %v29_v5 = vld [vmem:[%s3436_s0 + $0x18] sm:$0xff]  ;;  %v36_v6 = vsel %vm32_vm0, %v27_v2, 0.0  ;;  %v2614_v28 = vld [vmem:[%s3437_s3] sm:$0xff]   ;;  %v2615_v29 = vld [vmem:[%s3437_s3 + $0x8] sm:$0xff]  }
   0x3   :  { %34 = vadd.xlane.f32.xlu0 %v33_v3  ;;  %40 = vadd.xlane.f32.xlu1 %v39_v4  ;;  %v42_v7 = vsel %vm32_vm0, %v29_v5, 0.0  ;;  %v2275_v44 = vld [vmem:[%s3438_s4] ss:$0 sm:$0xff]  ;;  %v2276_v50 = vld [vmem:[%s3438_s4 + $0x1] ss:$0 sm:$0xff]  ;;  %s2786_s22 = smov 48  }
   0x4   :  { %2425 = vmatprep.subr.bf16.mxu0 %v2614_v28  ;;  %v2277_v63 = vld [vmem:[%s3438_s4 + $0x2] ss:$0 sm:$0xff]  ;;  %s2787_s26 = smov 16   ;;  %vm2123_vm13 = vcmask 1041409   ;;  %vm2126_vm14 = vcmask 1042434   ;;  %vm2129_vm15 = vcmask 1043459  }
   0x5   :  { %2426 = vmatpush3.bf16.msra.mxu0 %v2614_v28 }
   0x6   :  { %2427 = vmatprep.subr.bf16.mxu0 %v2615_v29 }
   0x7   :  { %37 = vadd.xlane.f32.xlu0 %v36_v6  ;;  %43 = vadd.xlane.f32.xlu1 %v42_v7 }
   0x9   :  { %2428 = vmatpush3.bf16.msra.mxu0 %v2615_v29 }
  0x90   :  { %v35_v8 = vpop.xlane.xlu0 %34  ;;  %v41_v9 = vpop.xlane.xlu1 %40 }
  0x91   :  { %v46_v10 = vmul.f32 0.03125, %v35_v8  ;;  %v48_v11 = vmul.f32 0.03125, %v41_v9 }
  0x93   :  { %v50_v12 = vsub.f32 %v26_v0, %v46_v10  ;;  %v52_v13 = vsub.f32 %v28_v1, %v48_v11 }
  0x94   :  { %v38_v14 = vpop.xlane.xlu0 %37  ;;  %v44_v15 = vpop.xlane.xlu1 %43 }
  0x95   :  { %v47_v16 = vmul.f32 0.03125, %v38_v14  ;;  %v49_v17 = vmul.f32 0.03125, %v44_v15  ;;  %v54_v18 = vmul.f32 %v50_v12, %v50_v12  ;;  %v56_v19 = vmul.f32 %v52_v13, %v52_v13 }
  0x97   :  { %v51_v20 = vsub.f32 %v27_v2, %v47_v16  ;;  %v53_v21 = vsub.f32 %v29_v5, %v49_v17  ;;  %v58_v22 = vsel %vm32_vm0, %v54_v18, 0.0  ;;  %v64_v23 = vsel %vm32_vm0, %v56_v19, 0.0  ;;  %v2894_v16 = vld [vmem:[%s3439_s2 + $0x18] sm:$0xff]  ;;  %v2899_v17 = vld [vmem:[%s3439_s2 + $0x8] sm:$0xff] }
  0x98   :  { %59 = vadd.xlane.f32.xlu0 %v58_v22 }
  0x99   :  { %v55_v24 = vmul.f32 %v51_v20, %v51_v20  ;;  %v57_v25 = vmul.f32 %v53_v21, %v53_v21 }
  0x9b   :  { %v61_v26 = vsel %vm32_vm0, %v55_v24, 0.0  ;;  %v67_v27 = vsel %vm32_vm0, %v57_v25, 0.0 }
  0x9c   :  { %65 = vadd.xlane.f32.xlu0 %v64_v23  ;;  %62 = vadd.xlane.f32.xlu1 %v61_v26 }
  0xa0   :  { %68 = vadd.xlane.f32.xlu1 %v67_v27 }
 0x125   :  { %v60_v30 = vpop.xlane.xlu0 %59 }
 0x126   :  { %v70_v31 = vmul.f32 0.03125, %v60_v30 }
 0x128   :  { %v74_v32 = vadd.f32 1e-12, %v70_v31 }
 0x129   :  { %v63_v33 = vpop.xlane.xlu1 %62  ;;  %v66_v34 = vpop.xlane.xlu0 %65 }
 0x12a   :  { %2638 = vrsqrt.f32 %v74_v32  ;;  %v71_v35 = vmul.f32 0.03125, %v63_v33  ;;  %v72_v36 = vmul.f32 0.03125, %v66_v34 }
 0x12c   :  { %v75_v37 = vadd.f32 1e-12, %v71_v35  ;;  %v76_v38 = vadd.f32 1e-12, %v72_v36 }
 0x12d   :  { %v69_v39 = vpop.xlane.xlu1 %68 }
 0x12e   :  { %2640 = vrsqrt.f32 %v75_v37  ;;  %v73_v40 = vmul.f32 0.03125, %v69_v39 }
 0x12f   :  { %2642 = vrsqrt.f32 %v76_v38 }
 0x130   :  { %v77_v41 = vadd.f32 1e-12, %v73_v40 }
 0x132   :  { %2644 = vrsqrt.f32 %v77_v41 }
 0x134   :  { %v2639_v42 = vpop.eup %2638 }
 0x135   :  { %v82_v43 = vmul.f32 %v2639_v42, %v50_v12 }
 0x137   :  { %v90_v48 = vmul.f32 %v2275_v44, %v82_v43 }
 0x138   :  { %v2641_v45 = vpop.eup %2640 }
 0x139   :  { %v2643_v46 = vpop.eup %2642  ;;  %v83_v47 = vmul.f32 %v2641_v45, %v51_v20  ;;  %v2853_v54 = vadd.f32 %v2276_v50, %v90_v48  ;;  %v2905_v20 = vld [vmem:[%s3439_s2 + $0x10] sm:$0xff] }
 0x13a   :  { %v84_v49 = vmul.f32 %v2643_v46, %v52_v13  ;;  %v2889_v13 = vld [vmem:[%s3439_s2] sm:$0xff] }
 0x13b   :  { %v91_v51 = vmul.f32 %v2275_v44, %v83_v47 }
 0x13c   :  { %v2645_v52 = vpop.eup %2644  ;;  %v92_v56 = vmul.f32 %v2275_v44, %v84_v49 }
 0x13d   :  { %v85_v53 = vmul.f32 %v2645_v52, %v53_v21  ;;  %v2855_v55 = vadd.f32 %v2276_v50, %v91_v51 }
 0x13e   :  { %v2860_v59 = vadd.f32 %v2276_v50, %v92_v56 }
 0x13f   :  { %v130_v57 = vpack.c.bf16 %v2855_v55, %v2853_v54  ;;  %v93_v58 = vmul.f32 %v2275_v44, %v85_v53 }
 0x141   :  { %2429 = vmatprep.mubr.msk.bf16.mxu0 %vm32_vm0, %v130_v57  ;;  %v2862_v60 = vadd.f32 %v2276_v50, %v93_v58 }
 0x143   :  { %v131_v61 = vpack.c.bf16 %v2862_v60, %v2860_v59 }
 0x145   :  { %2430 = vmatmul.mubr.msk.bf16.vlgmr.msra.gmra.mrb[0].mxu0 %vm32_vm0, %v131_v61 }
 0x218   :  { %v2431_v62 = vpop.f32.mrb[0].mxu0 }
 0x219   :  { %v188_v0 = vpop.f32.mrb[1].mxu0  ;;  %v197_v2 = vadd.f32 %v2431_v62, %v2277_v63 }
 0x21a   :  { %v2432_v1 = vpop.f32.mrb[2].mxu0  ;;  %v189_v5 = vadd.f32 %v2277_v63, %v188_v0 }
 0x21b   :  { %v200_v3 = vadd.f32 %v2432_v1, %v2277_v63  ;;  %v191_v4 = vpop.f32.mrb[3].mxu0 }
 0x21c   :  { %v192_v6 = vadd.f32 %v2277_v63, %v191_v4 }
 0x21d   :  { %v2870_v7 = vpack.c.bf16 %v200_v3, %v197_v2 }
 0x21e   :  { %v2872_v8 = vpack.c.bf16 %v192_v6, %v189_v5 }
 0x21f   :  { %209 = vrot.lane.b32.xlu1 %v2870_v7, %s2782_s10 }
 0x220   :  { %207 = vrot.lane.b32.xlu0 %v2872_v8, %s2782_s10  ;;  %2437 = vmatprep.mubr.msk.bf16.mxu1 %vm211_vm1, %v2872_v8 }
 0x291   :  { %v210_v11 = vpop.permute.xlu1 %209 }
 0x292   :  { %v208_v9 = vpop.permute.xlu0 %207  ;;  %v222_v12 = vsel %vm211_vm1, %v210_v11, 0 }
 0x293   :  { %2577 = vmatprep.subr.msk.bf16.mxu1 %vm211_vm1, %v208_v9  ;;  %v219_v10 = vsel %vm211_vm1, %v208_v9, 0 }
 0x294   :  { %2434 = vmatpush3.bf16.xpose.msra.mxu1 %v219_v10 }
 0x295   :  { %2578 = vmatprep.subr.msk.bf16.mxu1 %vm211_vm1, %v210_v11 }
 0x29c   :  { %2436 = vmatpush3.bf16.xpose.msra.mxu1 %v222_v12 }
 0x2a3   :  { %2438 = vmatmul.mubr.msk.bf16.vlgmr.msra.gmra.mrb[0].mxu1 %vm211_vm1, %v2870_v7 }
 0x376   :  { %v2439_v14 = vpop.f32.mrb[0].mxu1 }
 0x377   :  { %v258_v15 = vpop.f32.mrb[1].mxu1  ;;  %v267_v25 = vadd.f32 %v2439_v14, %v2905_v20 }
 0x378   :  { %v259_v18 = vadd.f32 %v258_v15, %v2889_v13  ;;  %v2440_v19 = vpop.f32.mrb[2].mxu1 }
 0x379   :  { %v261_v21 = vpop.f32.mrb[3].mxu1  ;;  %v270_v22 = vadd.f32 %v2440_v19, %v2894_v16  ;;  %v279_v28 = vsel %vm32_vm0, %v267_v25, -inf }
 0x37a   :  { %v262_v23 = vadd.f32 %v261_v21, %v2899_v17  ;;  %v273_v24 = vsel %vm32_vm0, %v259_v18, -inf }
 0x37b   :  { %274 = vmax.xlane.f32.xlu1 %v273_v24  ;;  %v282_v27 = vsel %vm32_vm0, %v270_v22, -inf }
 0x37c   :  { %v276_v26 = vsel %vm32_vm0, %v262_v23, -inf }
 0x37d   :  { %277 = vmax.xlane.f32.xlu0 %v276_v26 }
 0x37f   :  { %283 = vmax.xlane.f32.xlu1 %v282_v27 }
 0x381   :  { %280 = vmax.xlane.f32.xlu0 %v279_v28 }
 0x390   :  { %321 = vrot.lane.b32.xlu1 %v2870_v7, %s2783_s19 }
 0x408   :  { %v275_v29 = vpop.xlane.xlu1 %274 }
 0x409   :  { %v285_v33 = vsub.f32 %v259_v18, %v275_v29 }
 0x40a   :  { %v278_v30 = vpop.xlane.xlu0 %277 }
 0x40b   :  { %v286_v31 = vsub.f32 %v262_v23, %v278_v30  ;;  %v289_v39 = vmul.f32 1.442695, %v285_v33 }
 0x40c   :  { %v284_v32 = vpop.xlane.xlu1 %283 }
 0x40d   :  { %v288_v34 = vsub.f32 %v270_v22, %v284_v32  ;;  %v291_v35 = vmul.f32 1.442695, %v286_v31 }
 0x40e   :  { %v281_v36 = vpop.xlane.xlu0 %280 }
 0x40f   :  { %v295_v37 = vmul.f32 1.442695, %v288_v34  ;;  %v287_v38 = vsub.f32 %v267_v25, %v281_v36 }
 0x410   :  { %v322_v49 = vpop.permute.xlu1 %321 }
 0x411   :  { %2646 = vpow2.f32 %v295_v37  ;;  %v293_v40 = vmul.f32 1.442695, %v287_v38 }
 0x412   :  { %2648 = vpow2.f32 %v291_v35 }
 0x413   :  { %2650 = vpow2.f32 %v293_v40 }
 0x414   :  { %2652 = vpow2.f32 %v289_v39 }
 0x41b   :  { %v2647_v41 = vpop.eup %2646 }
 0x41c   :  { %v2649_v42 = vpop.eup %2648  ;;  %v306_v43 = vsel %vm32_vm0, %v2647_v41, 0.0 }
 0x41d   :  { %v2651_v44 = vpop.eup %2650  ;;  %307 = vadd.xlane.f32.xlu1 %v306_v43  ;;  %v300_v47 = vsel %vm32_vm0, %v2649_v42, 0.0 }
 0x41e   :  { %v303_v45 = vsel %vm32_vm0, %v2651_v44, 0.0  ;;  %v2653_v46 = vpop.eup %2652 }
 0x41f   :  { %304 = vadd.xlane.f32.xlu0 %v303_v45  ;;  %v297_v48 = vsel %vm32_vm0, %v2653_v46, 0.0 }
 0x421   :  { %301 = vadd.xlane.f32.xlu1 %v300_v47 }
 0x423   :  { %298 = vadd.xlane.f32.xlu0 %v297_v48 }
 0x432   :  { %384 = vrot.lane.b32.xlu1 %v2872_v8, %s2784_s20 }
 0x436   :  { %386 = vrot.lane.b32.xlu1 %v2870_v7, %s2784_s20 }
 0x439   :  { %319 = vrot.lane.b32.xlu0 %v2872_v8, %s2783_s19 }
 0x43a   :  { %382 = vrot.lane.b32.xlu1 %v2870_v7, %s2785_s21 }
 0x43d   :  { %380 = vrot.lane.b32.xlu0 %v2872_v8, %s2785_s21 }
 0x4aa   :  { %v308_v50 = vpop.xlane.xlu1 %307 }
 0x4ac   :  { %v305_v51 = vpop.xlane.xlu0 %304 }
 0x4ad   :  { %2654 = vrcp.f32 %v305_v51 }
 0x4ae   :  { %v302_v52 = vpop.xlane.xlu1 %301 }
 0x4af   :  { %2656 = vrcp.f32 %v302_v52 }
 0x4b0   :  { %2658 = vrcp.f32 %v308_v50  ;;  %v299_v53 = vpop.xlane.xlu0 %298 }
 0x4b1   :  { %2660 = vrcp.f32 %v299_v53 }
 0x4b2   :  { %v385_v62 = vpop.permute.xlu1 %384 }
 0x4b3   :  { %v395_v9 = vsel %vm211_vm1, %v385_v62, 0 }
 0x4b4   :  { %v320_v56 = vpop.permute.xlu0 %319 }
 0x4b5   :  { %2441 = vmatprep.subr.bf16.mxu0 %v320_v56 }
 0x4b6   :  { %2442 = vmatpush3.bf16.msra.mxu0 %v320_v56  ;;  %v387_v10 = vpop.permute.xlu1 %386 }
 0x4b7   :  { %2443 = vmatprep.subr.bf16.mxu0 %v322_v49  ;;  %v2655_v57 = vpop.eup %2654  ;;  %v398_v11 = vsel %vm211_vm1, %v387_v10, 0 }
 0x4b8   :  { %v315_v0 = vmul.f32 %v2655_v57, %v2651_v44  ;;  %v381_v6 = vpop.permute.xlu0 %380 }
 0x4b9   :  { %v2657_v58 = vpop.eup %2656 }
 0x4ba   :  { %v2659_v61 = vpop.eup %2658  ;;  %2444 = vmatpush3.bf16.msra.mxu0 %v322_v49  ;;  %v314_v2 = vmul.f32 %v2657_v58, %v2649_v42  ;;  %v383_v12 = vpop.permute.xlu1 %382 }
 0x4bb   :  { %v2661_v63 = vpop.eup %2660  ;;  %2579 = vmatprep.subr.msk.bf16.mxu0 %vm211_vm1, %v385_v62  ;;  %v316_v3 = vmul.f32 %v2659_v61, %v2647_v41 }
 0x4bc   :  { %v313_v1 = vmul.f32 %v2661_v63, %v2653_v46 }
 0x4bd   :  { %v318_v5 = vpack.c.bf16 %v316_v3, %v315_v0  ;;  %v2616_v3 = vld [vmem:[%s3437_s3 + $0x10] sm:$0xff]  }
 0x4be   :  { %v317_v4 = vpack.c.bf16 %v314_v2, %v313_v1 }
 0x4c0   :  { %2445 = vmatprep.mubr.msk.bf16.mxu0 %vm32_vm0, %v317_v4  ;;  %v2617_v4 = vld [vmem:[%s3437_s3 + $0x18] sm:$0xff]  }
 0x4c1   :  { %2446 = vmatmul.mubr.msk.bf16.vlgmr.msra.gmra.mrb[4].mxu0 %vm32_vm0, %v318_v5 }
 0x4c2   :  { %2453 = vmatprep.mubr.msk.bf16.mxu0 %vm211_vm1, %v381_v6 }
 0x4c3   :  { %2450 = vmatpush3.bf16.xpose.msra.mxu0 %v395_v9 }
 0x4c4   :  { %2580 = vmatprep.subr.msk.bf16.mxu0 %vm211_vm1, %v387_v10 }
 0x4cb   :  { %2452 = vmatpush3.bf16.xpose.msra.mxu0 %v398_v11 }
 0x4d2   :  { %2454 = vmatmul.mubr.msk.bf16.vlgmr.msra.gmra.mrb[8].mxu0 %vm211_vm1, %v383_v12 }
 0x594   :  { %v2938_v14 = vpop.f32.mrb[4].mxu0 }
 0x595   :  { %v2940_v15 = vpop.f32.mrb[5].mxu0 }
 0x596   :  { %v2942_v18 = vpop.f32.mrb[6].mxu0 }
 0x597   :  { %v2944_v19 = vpop.f32.mrb[7].mxu0 }
 0x5a5   :  { %v2455_v21 = vpop.f32.mrb[8].mxu0 }
 0x5a6   :  { %v434_v22 = vpop.f32.mrb[9].mxu0  ;;  %v443_v26 = vadd.f32 %v2455_v21, %v2905_v20 }
 0x5a7   :  { %v435_v23 = vadd.f32 %v434_v22, %v2889_v13  ;;  %v2456_v24 = vpop.f32.mrb[10].mxu0 }
 0x5a8   :  { %v437_v25 = vpop.f32.mrb[11].mxu0  ;;  %v446_v30 = vadd.f32 %v2456_v24, %v2894_v16  ;;  %v455_v31 = vsel %vm32_vm0, %v443_v26, -inf }
 0x5a9   :  { %v438_v27 = vadd.f32 %v437_v25, %v2899_v17  ;;  %v449_v28 = vsel %vm32_vm0, %v435_v23, -inf }
 0x5aa   :  { %450 = vmax.xlane.f32.xlu0 %v449_v28  ;;  %v458_v32 = vsel %vm32_vm0, %v446_v30, -inf }
 0x5ab   :  { %v452_v29 = vsel %vm32_vm0, %v438_v27, -inf }
 0x5ac   :  { %453 = vmax.xlane.f32.xlu1 %v452_v29 }
 0x5ae   :  { %456 = vmax.xlane.f32.xlu0 %v455_v31 }
 0x5b2   :  { %459 = vmax.xlane.f32.xlu0 %v458_v32 }
 0x637   :  { %v451_v13 = vpop.xlane.xlu0 %450 }
 0x638   :  { %v461_v33 = vsub.f32 %v435_v23, %v451_v13 }
 0x639   :  { %v454_v34 = vpop.xlane.xlu1 %453 }
 0x63a   :  { %v465_v17 = vmul.f32 1.442695, %v461_v33  ;;  %v462_v36 = vsub.f32 %v438_v27, %v454_v34 }
 0x63b   :  { %v457_v20 = vpop.xlane.xlu0 %456 }
 0x63c   :  { %v463_v35 = vsub.f32 %v443_v26, %v457_v20  ;;  %v467_v40 = vmul.f32 1.442695, %v462_v36 }
 0x63e   :  { %v469_v37 = vmul.f32 1.442695, %v463_v35 }
 0x63f   :  { %v460_v38 = vpop.xlane.xlu0 %459 }
 0x640   :  { %2662 = vpow2.f32 %v469_v37  ;;  %v464_v39 = vsub.f32 %v446_v30, %v460_v38 }
 0x641   :  { %2664 = vpow2.f32 %v465_v17 }
 0x642   :  { %v471_v16 = vmul.f32 1.442695, %v464_v39 }
 0x644   :  { %2666 = vpow2.f32 %v471_v16 }
 0x645   :  { %2668 = vpow2.f32 %v467_v40 }
 0x64a   :  { %v2663_v41 = vpop.eup %2662 }
 0x64b   :  { %v479_v42 = vsel %vm32_vm0, %v2663_v41, 0.0  ;;  %v2665_v43 = vpop.eup %2664 }
 0x64c   :  { %480 = vadd.xlane.f32.xlu0 %v479_v42  ;;  %v473_v45 = vsel %vm32_vm0, %v2665_v43, 0.0 }
 0x64e   :  { %v2667_v44 = vpop.eup %2666 }
 0x64f   :  { %v482_v46 = vsel %vm32_vm0, %v2667_v44, 0.0  ;;  %v2669_v47 = vpop.eup %2668 }
 0x650   :  { %474 = vadd.xlane.f32.xlu0 %v473_v45  ;;  %483 = vadd.xlane.f32.xlu1 %v482_v46  ;;  %v476_v48 = vsel %vm32_vm0, %v2669_v47, 0.0 }
 0x654   :  { %477 = vadd.xlane.f32.xlu1 %v476_v48 }
 0x665   :  { %497 = vrot.lane.b32.xlu1 %v2870_v7, %s2786_s22 }
 0x666   :  { %495 = vrot.lane.b32.xlu0 %v2872_v8, %s2786_s22 }
 0x6d9   :  { %v481_v49 = vpop.xlane.xlu0 %480 }
 0x6dd   :  { %v484_v50 = vpop.xlane.xlu1 %483  ;;  %v475_v51 = vpop.xlane.xlu0 %474 }
 0x6de   :  { %2670 = vrcp.f32 %v484_v50 }
 0x6df   :  { %2672 = vrcp.f32 %v475_v51 }
 0x6e0   :  { %2674 = vrcp.f32 %v481_v49 }
 0x6e1   :  { %v478_v52 = vpop.xlane.xlu1 %477  ;;  %v496_v53 = vpop.permute.xlu0 %495 }
 0x6e2   :  { %2676 = vrcp.f32 %v478_v52  ;;  %2457 = vmatprep.subr.bf16.mxu1 %v496_v53 }
 0x6e3   :  { %2458 = vmatpush3.bf16.msra.mxu1 %v496_v53 }
 0x6e5   :  { %v498_v56 = vpop.permute.xlu1 %497 }
 0x6e6   :  { %2459 = vmatprep.subr.bf16.mxu1 %v498_v56 }
 0x6e7   :  { %2460 = vmatpush3.bf16.msra.mxu1 %v498_v56 }
 0x6e8   :  { %v2671_v57 = vpop.eup %2670  ;;  %2465 = vmatprep.subr.bf16.mxu1 %v2616_v3 }
 0x6e9   :  { %v2673_v58 = vpop.eup %2672  ;;  %v492_v62 = vmul.f32 %v2671_v57, %v2667_v44 }
 0x6ea   :  { %v2675_v7 = vpop.eup %2674  ;;  %v489_v8 = vmul.f32 %v2673_v58, %v2665_v43 }
 0x6eb   :  { %v491_v0 = vmul.f32 %v2675_v7, %v2663_v41 }
 0x6ec   :  { %v2677_v61 = vpop.eup %2676 }
 0x6ed   :  { %v490_v63 = vmul.f32 %v2677_v61, %v2669_v47  ;;  %v494_v2 = vpack.c.bf16 %v492_v62, %v491_v0  ;;  %v2618_v61 = vld [vmem:[%s3437_s3 + $0x20] sm:$0xff]   ;;  %v2619_v62 = vld [vmem:[%s3437_s3 + $0x28] sm:$0xff]  }
 0x6ee   :  { %2473 = vmatprep.subr.bf16.mxu0 %v2618_v61 }
 0x6ef   :  { %v493_v1 = vpack.c.bf16 %v490_v63, %v489_v8  ;;  %2474 = vmatpush3.bf16.msra.mxu0 %v2618_v61 }
 0x6f0   :  { %2475 = vmatprep.subr.bf16.mxu0 %v2619_v62 }
 0x6f1   :  { %2461 = vmatprep.mubr.msk.bf16.mxu1 %vm32_vm0, %v493_v1 }
 0x6f2   :  { %2462 = vmatmul.mubr.msk.bf16.vlgmr.msra.gmra.mrb[4].mxu1 %vm32_vm0, %v494_v2 }
 0x6f3   :  { %2466 = vmatpush3.bf16.msra.mxu1 %v2616_v3  ;;  %2476 = vmatpush3.bf16.msra.mxu0 %v2619_v62 }
 0x6f4   :  { %2467 = vmatprep.subr.bf16.mxu1 %v2617_v4 }
 0x6f7   :  { %2468 = vmatpush3.bf16.msra.mxu1 %v2617_v4 }
 0x7c5   :  { %v2463_v5 = vpop.f32.mrb[4].mxu1 }
 0x7c6   :  { %v541_v6 = vpop.f32.mrb[5].mxu1 }
 0x7c7   :  { %v2464_v9 = vpop.f32.mrb[6].mxu1 }
 0x7c8   :  { %v2599_v10 = vpack.i.bf16 %v2464_v9, %v2463_v5  ;;  %v544_v11 = vpop.f32.mrb[7].mxu1 }
 0x7c9   :  { %v2594_v12 = vpack.i.bf16 %v544_v11, %v541_v6 }
 0x7cb   :  { %2595 = vrot.lane.b32.xlu1 %v2594_v12, %s2787_s26 }
 0x7cf   :  { %2600 = vrot.lane.b32.xlu1 %v2599_v10, %s2787_s26 }
 0x83d   :  { %v2596_v21 = vpop.permute.xlu1 %2595 }
 0x83e   :  { %v2598_v22 = vunpack.i.h.bf16 %v2596_v21  ;;  %v2597_v23 = vunpack.i.l.bf16 %v2596_v21  ;;  %v2295_v21 = vld [vmem:[%s3438_s4 + $0x4] ss:$0 sm:$0xff] }
 0x840   :  { %v573_v24 = vsel %vm211_vm1, %v2944_v19, %v2598_v22  ;;  %v572_v25 = vsel %vm211_vm1, %v2940_v15, %v2597_v23  ;;  %v2290_v19 = vld [vmem:[%s3438_s4 + $0x3] ss:$0 sm:$0xff] }
 0x841   :  { %v576_v26 = vpack.c.bf16 %v573_v24, %v572_v25  ;;  %v2601_v27 = vpop.permute.xlu1 %2600 }
 0x842   :  { %v2603_v28 = vunpack.i.h.bf16 %v2601_v27  ;;  %v2602_v29 = vunpack.i.l.bf16 %v2601_v27  ;;  %v2296_v27 = vld [vmem:[%s3438_s4 + $0x5] ss:$0 sm:$0xff] }
 0x843   :  { %2469 = vmatprep.mubr.msk.bf16.mxu1 %vm32_vm0, %v576_v26 }
 0x844   :  { %v575_v30 = vsel %vm211_vm1, %v2942_v18, %v2603_v28  ;;  %v574_v31 = vsel %vm211_vm1, %v2938_v14, %v2602_v29 }
 0x845   :  { %v577_v32 = vpack.c.bf16 %v575_v30, %v574_v31 }
 0x847   :  { %2470 = vmatmul.mubr.msk.bf16.vlgmr.msra.gmra.mrb[8].mxu1 %vm32_vm0, %v577_v32 }
 0x91a   :  { %v2471_v15 = vpop.f32.mrb[8].mxu1 }
 0x91b   :  { %v634_v13 = vpop.f32.mrb[9].mxu1  ;;  %v643_v33 = vadd.f32 %v2471_v15, %v2290_v19 }
 0x91c   :  { %v635_v34 = vadd.f32 %v2290_v19, %v634_v13  ;;  %v2472_v20 = vpop.f32.mrb[10].mxu1 }
 0x91d   :  { %v637_v35 = vpop.f32.mrb[11].mxu1  ;;  %v646_v18 = vadd.f32 %v2472_v20, %v2290_v19  ;;  %v651_v38 = vadd.f32 %v643_v33, %v2860_v59 }
 0x91e   :  { %v638_v17 = vadd.f32 %v2290_v19, %v637_v35  ;;  %v649_v36 = vadd.f32 %v635_v34, %v2853_v54 }
 0x91f   :  { %v659_v40 = vsel %vm32_vm0, %v651_v38, 0.0  ;;  %v652_v16 = vadd.f32 %v646_v18, %v2862_v60  ;;  %v2622_v18 = vld [vmem:[%s3437_s3 + $0x40] sm:$0xff]  }
 0x920   :  { %v653_v37 = vsel %vm32_vm0, %v649_v36, 0.0  ;;  %v650_v14 = vadd.f32 %v638_v17, %v2855_v55  ;;  %v2620_v17 = vld [vmem:[%s3437_s3 + $0x30] sm:$0xff]  }
 0x921   :  { %654 = vadd.xlane.f32.xlu0 %v653_v37  ;;  %v662_v41 = vsel %vm32_vm0, %v652_v16, 0.0  ;;  %2481 = vmatprep.subr.bf16.mxu1 %v2620_v17  ;;  %v2623_v37 = vld [vmem:[%s3437_s3 + $0x48] sm:$0xff]  }
 0x922   :  { %v656_v39 = vsel %vm32_vm0, %v650_v14, 0.0  ;;  %2482 = vmatpush3.bf16.msra.mxu1 %v2620_v17 }
 0x923   :  { %657 = vadd.xlane.f32.xlu1 %v656_v39 }
 0x925   :  { %660 = vadd.xlane.f32.xlu0 %v659_v40 }
 0x929   :  { %663 = vadd.xlane.f32.xlu0 %v662_v41 }
 0x9ae   :  { %v655_v54 = vpop.xlane.xlu0 %654 }
 0x9af   :  { %v665_v42 = vmul.f32 0.03125, %v655_v54 }
 0x9b0   :  { %v658_v43 = vpop.xlane.xlu1 %657 }
 0x9b1   :  { %v669_v44 = vsub.f32 %v649_v36, %v665_v42  ;;  %v666_v45 = vmul.f32 0.03125, %v658_v43  ;;  %v2621_v36 = vld [vmem:[%s3437_s3 + $0x38] sm:$0xff]  }
 0x9b2   :  { %v661_v55 = vpop.xlane.xlu0 %660  ;;  %2483 = vmatprep.subr.bf16.mxu1 %v2621_v36 }
 0x9b3   :  { %v670_v46 = vsub.f32 %v650_v14, %v666_v45  ;;  %v667_v59 = vmul.f32 0.03125, %v661_v55  ;;  %v673_v47 = vmul.f32 %v669_v44, %v669_v44  ;;  %2484 = vmatpush3.bf16.msra.mxu1 %v2621_v36  ;;  %v2297_v14 = vld [vmem:[%s3438_s4 + $0x6] ss:$0 sm:$0xff] }
 0x9b4   :  { %2485 = vmatprep.subr.bf16.mxu1 %v2622_v18 }
 0x9b5   :  { %v671_v48 = vsub.f32 %v651_v38, %v667_v59  ;;  %v677_v49 = vsel %vm32_vm0, %v673_v47, 0.0  ;;  %v674_v50 = vmul.f32 %v670_v46, %v670_v46 }
 0x9b6   :  { %678 = vadd.xlane.f32.xlu0 %v677_v49  ;;  %v664_v51 = vpop.xlane.xlu0 %663 }
 0x9b7   :  { %v668_v60 = vmul.f32 0.03125, %v664_v51  ;;  %v680_v52 = vsel %vm32_vm0, %v674_v50, 0.0  ;;  %v675_v53 = vmul.f32 %v671_v48, %v671_v48  ;;  %2486 = vmatpush3.bf16.msra.mxu1 %v2622_v18 }
 0x9b8   :  { %681 = vadd.xlane.f32.xlu1 %v680_v52  ;;  %2487 = vmatprep.subr.bf16.mxu1 %v2623_v37 }
 0x9b9   :  { %v672_v56 = vsub.f32 %v652_v16, %v668_v60  ;;  %v683_v57 = vsel %vm32_vm0, %v675_v53, 0.0 }
 0x9ba   :  { %684 = vadd.xlane.f32.xlu0 %v683_v57 }
 0x9bb   :  { %v676_v58 = vmul.f32 %v672_v56, %v672_v56  ;;  %2488 = vmatpush3.bf16.msra.mxu1 %v2623_v37 }
 0x9bd   :  { %v686_v7 = vsel %vm32_vm0, %v676_v58, 0.0 }
 0x9be   :  { %687 = vadd.xlane.f32.xlu1 %v686_v7 }
 0xa43   :  { %v679_v8 = vpop.xlane.xlu0 %678 }
 0xa44   :  { %v689_v63 = vmul.f32 0.03125, %v679_v8 }
 0xa45   :  { %v682_v0 = vpop.xlane.xlu1 %681 }
 0xa46   :  { %v693_v1 = vadd.f32 1e-12, %v689_v63  ;;  %v690_v2 = vmul.f32 0.03125, %v682_v0 }
 0xa47   :  { %v685_v3 = vpop.xlane.xlu0 %684 }
 0xa48   :  { %2678 = vrsqrt.f32 %v693_v1  ;;  %v694_v4 = vadd.f32 1e-12, %v690_v2  ;;  %v691_v5 = vmul.f32 0.03125, %v685_v3 }
 0xa4a   :  { %2680 = vrsqrt.f32 %v694_v4  ;;  %v695_v6 = vadd.f32 1e-12, %v691_v5 }
 0xa4b   :  { %v688_v9 = vpop.xlane.xlu1 %687 }
 0xa4c   :  { %2682 = vrsqrt.f32 %v695_v6  ;;  %v692_v10 = vmul.f32 0.03125, %v688_v9 }
 0xa4e   :  { %v696_v11 = vadd.f32 1e-12, %v692_v10 }
 0xa50   :  { %2684 = vrsqrt.f32 %v696_v11 }
 0xa52   :  { %v2679_v12 = vpop.eup %2678 }
 0xa53   :  { %v701_v22 = vmul.f32 %v2679_v12, %v669_v44 }
 0xa54   :  { %v2681_v23 = vpop.eup %2680 }
 0xa55   :  { %v702_v24 = vmul.f32 %v2681_v23, %v670_v46  ;;  %v709_v25 = vmul.f32 %v2295_v21, %v701_v22 }
 0xa56   :  { %v2683_v26 = vpop.eup %2682 }
 0xa57   :  { %v703_v28 = vmul.f32 %v2683_v26, %v671_v48  ;;  %v710_v29 = vmul.f32 %v2295_v21, %v702_v24  ;;  %v3009_v30 = vadd.f32 %v2296_v27, %v709_v25 }
 0xa59   :  { %v3011_v31 = vadd.f32 %v2296_v27, %v710_v29  ;;  %v711_v19 = vmul.f32 %v2295_v21, %v703_v28 }
 0xa5a   :  { %v2685_v32 = vpop.eup %2684 }
 0xa5b   :  { %v704_v15 = vmul.f32 %v2685_v32, %v672_v56  ;;  %v721_v13 = vpack.c.bf16 %v3011_v31, %v3009_v30  ;;  %v3016_v34 = vadd.f32 %v2296_v27, %v711_v19 }
 0xa5d   :  { %v712_v33 = vmul.f32 %v2295_v21, %v704_v15  ;;  %2477 = vmatprep.mubr.msk.bf16.mxu0 %vm32_vm0, %v721_v13 }
 0xa5f   :  { %v3018_v20 = vadd.f32 %v2296_v27, %v712_v33 }
 0xa61   :  { %v722_v35 = vpack.c.bf16 %v3018_v20, %v3016_v34 }
 0xa63   :  { %2478 = vmatmul.mubr.msk.bf16.vlgmr.msra.gmra.mrb[12].mxu0 %vm32_vm0, %v722_v35 }
 0xb36   :  { %v2479_v38 = vpop.f32.mrb[12].mxu0 }
 0xb37   :  { %v3038_v39 = vadd.f32 %v2479_v38, %v2297_v14  ;;  %v779_v40 = vpop.f32.mrb[13].mxu0 }
 0xb38   :  { %v3040_v16 = vadd.f32 %v2297_v14, %v779_v40  ;;  %v2480_v41 = vpop.f32.mrb[14].mxu0 }
 0xb39   :  { %v3043_v54 = vmul.f32 0.70710677, %v3038_v39  ;;  %v3045_v42 = vadd.f32 %v2480_v41, %v2297_v14  ;;  %v782_v43 = vpop.f32.mrb[15].mxu0 }
 0xb3a   :  { %v3048_v44 = vmul.f32 0.70710677, %v3040_v16  ;;  %v3050_v45 = vadd.f32 %v2297_v14, %v782_v43 }
 0xb3b   :  { %vm804_vm2 = vcmp.ge.f32.partialorder %v3043_v54, 0.0  ;;  %v808_v55 = vsub.f32 0.0, %v3043_v54  ;;  %v3055_v46 = vmul.f32 0.70710677, %v3045_v42 }
 0xb3c   :  { %vm802_vm3 = vcmp.ge.f32.partialorder %v3048_v44, 0.0  ;;  %v806_v59 = vsub.f32 0.0, %v3048_v44  ;;  %v3060_v47 = vmul.f32 0.70710677, %v3050_v45 }
 0xb3d   :  { %v812_v48 = vsel %vm804_vm2, %v3043_v54, %v808_v55  ;;  %vm805_vm4 = vcmp.ge.f32.partialorder %v3055_v46, 0.0  ;;  %v809_v49 = vsub.f32 0.0, %v3055_v46  ;;  %v794_v54 = vmul.f32 0.5, %v3040_v16 }
 0xb3e   :  { %v816_v50 = vmul.f32 0.3275911, %v812_v48  ;;  %v810_v51 = vsel %vm802_vm3, %v3048_v44, %v806_v59  ;;  %vm803_vm5 = vcmp.ge.f32.partialorder %v3060_v47, 0.0  ;;  %v807_v53 = vsub.f32 0.0, %v3060_v47 }
 0xb3f   :  { %v814_v60 = vmul.f32 0.3275911, %v810_v51  ;;  %v813_v52 = vsel %vm805_vm4, %v3055_v46, %v809_v49  ;;  %v868_v63 = vmul.f32 %v812_v48, %v812_v48  ;;  %v866_v0 = vmul.f32 %v810_v51, %v810_v51 }
 0xb40   :  { %v820_v56 = vadd.f32 1.0, %v816_v50  ;;  %v817_v57 = vmul.f32 0.3275911, %v813_v52  ;;  %v811_v7 = vsel %vm803_vm5, %v3060_v47, %v807_v53  ;;  %v869_v3 = vmul.f32 %v813_v52, %v813_v52 }
 0xb41   :  { %v818_v58 = vadd.f32 1.0, %v814_v60  ;;  %v815_v62 = vmul.f32 0.3275911, %v811_v7  ;;  %v872_v2 = vsub.f32 0.0, %v868_v63  ;;  %v870_v6 = vsub.f32 0.0, %v866_v0 }
 0xb42   :  { %2686 = vrcp.f32 %v820_v56  ;;  %v821_v61 = vadd.f32 1.0, %v817_v57  ;;  %v867_v10 = vmul.f32 %v811_v7, %v811_v7  ;;  %v873_v23 = vsub.f32 0.0, %v869_v3 }
 0xb43   :  { %2688 = vrcp.f32 %v818_v58  ;;  %v819_v8 = vadd.f32 1.0, %v815_v62  ;;  %v878_v21 = vmul.f32 1.442695, %v872_v2  ;;  %v874_v25 = vmul.f32 1.442695, %v870_v6 }
 0xb44   :  { %2690 = vrcp.f32 %v821_v61  ;;  %v871_v29 = vsub.f32 0.0, %v867_v10  ;;  %v880_v33 = vmul.f32 1.442695, %v873_v23 }
 0xb45   :  { %2692 = vrcp.f32 %v819_v8 }
 0xb46   :  { %2694 = vpow2.f32 %v878_v21  ;;  %v876_v37 = vmul.f32 1.442695, %v871_v29 }
 0xb47   :  { %2696 = vpow2.f32 %v874_v25 }
 0xb48   :  { %2698 = vpow2.f32 %v880_v33 }
 0xb49   :  { %2700 = vpow2.f32 %v876_v37 }
 0xb4c   :  { %v2687_v1 = vpop.eup %2686 }
 0xb4d   :  { %v2689_v4 = vpop.eup %2688  ;;  %v832_v5 = vmul.f32 1.0614054, %v2687_v1 }
 0xb4e   :  { %v830_v9 = vmul.f32 1.0614054, %v2689_v4  ;;  %v2691_v12 = vpop.eup %2690 }
 0xb4f   :  { %v836_v11 = vadd.f32 -1.4531521, %v832_v5  ;;  %v833_v26 = vmul.f32 1.0614054, %v2691_v12  ;;  %v2693_v27 = vpop.eup %2692 }
 0xb50   :  { %v834_v22 = vadd.f32 -1.4531521, %v830_v9  ;;  %v831_v15 = vmul.f32 1.0614054, %v2693_v27  ;;  %v2695_v57 = vpop.eup %2694 }
 0xb51   :  { %v840_v24 = vmul.f32 %v2687_v1, %v836_v11  ;;  %v837_v19 = vadd.f32 -1.4531521, %v833_v26  ;;  %v2697_v7 = vpop.eup %2696 }
 0xb52   :  { %v838_v28 = vmul.f32 %v2689_v4, %v834_v22  ;;  %v835_v36 = vadd.f32 -1.4531521, %v831_v15  ;;  %v2699_v5 = vpop.eup %2698 }
 0xb53   :  { %v844_v32 = vadd.f32 1.4214138, %v840_v24  ;;  %v841_v17 = vmul.f32 %v2691_v12, %v837_v19  ;;  %v2701_v21 = vpop.eup %2700  ;;  %v797_v19 = vmul.f32 0.5, %v3045_v42 }
 0xb54   :  { %v842_v13 = vadd.f32 1.4214138, %v838_v28  ;;  %v839_v40 = vmul.f32 %v2693_v27, %v835_v36 }
 0xb55   :  { %v848_v35 = vmul.f32 %v2687_v1, %v844_v32  ;;  %v845_v38 = vadd.f32 1.4214138, %v841_v17  ;;  %v796_v32 = vmul.f32 0.5, %v3038_v39  ;;  %v2302_v39 = vld [vmem:[%s3438_s4 + $0x7] ss:$0 sm:$0xff] }
 0xb56   :  { %v846_v18 = vmul.f32 %v2689_v4, %v842_v13  ;;  %v843_v59 = vadd.f32 1.4214138, %v839_v40 }
 0xb57   :  { %v852_v14 = vadd.f32 -0.28449672, %v848_v35  ;;  %v849_v55 = vmul.f32 %v2691_v12, %v845_v38  ;;  %v795_v35 = vmul.f32 0.5, %v3050_v45 }
 0xb58   :  { %v850_v41 = vadd.f32 -0.28449672, %v846_v18  ;;  %v847_v51 = vmul.f32 %v2693_v27, %v843_v59 }
 0xb59   :  { %v856_v43 = vmul.f32 %v2687_v1, %v852_v14  ;;  %v853_v50 = vadd.f32 -0.28449672, %v849_v55 }
 0xb5a   :  { %v854_v48 = vmul.f32 %v2689_v4, %v850_v41  ;;  %v851_v56 = vadd.f32 -0.28449672, %v847_v51 }
 0xb5b   :  { %v860_v49 = vadd.f32 0.2548296, %v856_v43  ;;  %v857_v53 = vmul.f32 %v2691_v12, %v853_v50 }
 0xb5c   :  { %v858_v60 = vadd.f32 0.2548296, %v854_v48  ;;  %v855_v8 = vmul.f32 %v2693_v27, %v851_v56 }
 0xb5d   :  { %v864_v52 = vmul.f32 %v2687_v1, %v860_v49  ;;  %v861_v62 = vadd.f32 0.2548296, %v857_v53 }
 0xb5e   :  { %v862_v58 = vmul.f32 %v2689_v4, %v858_v60  ;;  %v859_v3 = vadd.f32 0.2548296, %v855_v8 }
 0xb5f   :  { %v884_v61 = vmul.f32 %v2695_v57, %v864_v52  ;;  %v865_v2 = vmul.f32 %v2691_v12, %v861_v62 }
 0xb60   :  { %v882_v63 = vmul.f32 %v2697_v7, %v862_v58  ;;  %v863_v11 = vmul.f32 %v2693_v27, %v859_v3 }
 0xb61   :  { %v888_v0 = vsub.f32 1.0, %v884_v61  ;;  %v885_v10 = vmul.f32 %v2699_v5, %v865_v2 }
 0xb62   :  { %v886_v6 = vsub.f32 1.0, %v882_v63  ;;  %v883_v4 = vmul.f32 %v2701_v21, %v863_v11  ;;  %v2625_v11 = vld [vmem:[%s3437_s3 + $0x58] sm:$0xff]  }
 0xb63   :  { %v892_v9 = vsub.f32 0.0, %v888_v0  ;;  %v889_v23 = vsub.f32 1.0, %v885_v10  ;;  %v2624_v10 = vld [vmem:[%s3437_s3 + $0x50] sm:$0xff]  }
 0xb64   :  { %v890_v22 = vsub.f32 0.0, %v886_v6  ;;  %v887_v26 = vsub.f32 1.0, %v883_v4  ;;  %2493 = vmatprep.subr.bf16.mxu0 %v2624_v10 }
 0xb65   :  { %v896_v1 = vsel %vm804_vm2, %v888_v0, %v892_v9  ;;  %v893_v25 = vsub.f32 0.0, %v889_v23  ;;  %2494 = vmatpush3.bf16.msra.mxu0 %v2624_v10  ;;  %vm2268_vm2 = vcmask 392192  }
 0xb66   :  { %v894_v24 = vsel %vm802_vm3, %v886_v6, %v890_v22  ;;  %v900_v28 = vadd.f32 1.0, %v896_v1  ;;  %v891_v29 = vsub.f32 0.0, %v887_v26  ;;  %2495 = vmatprep.subr.bf16.mxu0 %v2625_v11 }
 0xb67   :  { %v897_v12 = vsel %vm805_vm4, %v889_v23, %v893_v25  ;;  %v898_v27 = vadd.f32 1.0, %v894_v24 }
 0xb68   :  { %v901_v15 = vadd.f32 1.0, %v897_v12  ;;  %v895_v13 = vsel %vm803_vm5, %v887_v26, %v891_v29  ;;  %v904_v44 = vmul.f32 %v900_v28, %v796_v32 }
 0xb69   :  { %v899_v17 = vadd.f32 1.0, %v895_v13  ;;  %v902_v36 = vmul.f32 %v898_v27, %v794_v54  ;;  %2496 = vmatpush3.bf16.msra.mxu0 %v2625_v11 }
 0xb6a   :  { %v905_v33 = vmul.f32 %v901_v15, %v797_v19  ;;  %v2309_v19 = vld [vmem:[%s3438_s4 + $0x8] ss:$0 sm:$0xff] }
 0xb6b   :  { %v903_v18 = vmul.f32 %v899_v17, %v795_v35  ;;  %v2310_v35 = vld [vmem:[%s3438_s4 + $0x9] ss:$0 sm:$0xff] }
 0xb6c   :  { %v907_v46 = vpack.c.bf16 %v905_v33, %v904_v44 }
 0xb6d   :  { %v906_v37 = vpack.c.bf16 %v903_v18, %v902_v36 }
 0xb6f   :  { %2489 = vmatprep.mubr.msk.bf16.mxu1 %vm936_vm6, %v906_v37 }
 0xb70   :  { %2490 = vmatmul.mubr.msk.bf16.vlgmr.msra.gmra.mrb[12].mxu1 %vm936_vm6, %v907_v46 }
 0xc43   :  { %v2491_v16 = vpop.f32.mrb[12].mxu1 }
 0xc44   :  { %v977_v42 = vpop.f32.mrb[13].mxu1  ;;  %v986_v47 = vadd.f32 %v2491_v16, %v2302_v39 }
 0xc45   :  { %v978_v14 = vadd.f32 %v2302_v39, %v977_v42  ;;  %v2492_v38 = vpop.f32.mrb[14].mxu1 }
 0xc46   :  { %v980_v45 = vpop.f32.mrb[15].mxu1  ;;  %v989_v40 = vadd.f32 %v2492_v38, %v2302_v39  ;;  %v994_v48 = vadd.f32 %v986_v47, %v3016_v34 }
 0xc47   :  { %v981_v41 = vadd.f32 %v2302_v39, %v980_v45  ;;  %v992_v43 = vadd.f32 %v978_v14, %v3009_v30 }
 0xc48   :  { %v995_v50 = vadd.f32 %v989_v40, %v3018_v20  ;;  %v1002_v51 = vsel %vm32_vm0, %v994_v48, 0.0 }
 0xc49   :  { %v996_v55 = vsel %vm32_vm0, %v992_v43, 0.0  ;;  %v993_v59 = vadd.f32 %v981_v41, %v3011_v31  ;;  %v2311_v41 = vld [vmem:[%s3438_s4 + $0xa] ss:$0 sm:$0xff] }
 0xc4a   :  { %997 = vadd.xlane.f32.xlu0 %v996_v55  ;;  %v1005_v60 = vsel %vm32_vm0, %v995_v50, 0.0 }
 0xc4b   :  { %v999_v49 = vsel %vm32_vm0, %v993_v59, 0.0 }
 0xc4c   :  { %1000 = vadd.xlane.f32.xlu1 %v999_v49 }
 0xc4e   :  { %1003 = vadd.xlane.f32.xlu0 %v1002_v51 }
 0xc50   :  { %1006 = vadd.xlane.f32.xlu1 %v1005_v60 }
 0xcd7   :  { %v998_v52 = vpop.xlane.xlu0 %997 }
 0xcd8   :  { %v1008_v30 = vmul.f32 0.03125, %v998_v52 }
 0xcd9   :  { %v1001_v53 = vpop.xlane.xlu1 %1000 }
 0xcda   :  { %v1012_v56 = vsub.f32 %v992_v43, %v1008_v30  ;;  %v1009_v57 = vmul.f32 0.03125, %v1001_v53 }
 0xcdb   :  { %v1004_v31 = vpop.xlane.xlu0 %1003 }
 0xcdc   :  { %v1013_v58 = vsub.f32 %v993_v59, %v1009_v57  ;;  %v1010_v34 = vmul.f32 0.03125, %v1004_v31  ;;  %v1016_v7 = vmul.f32 %v1012_v56, %v1012_v56 }
 0xcdd   :  { %v1007_v61 = vpop.xlane.xlu1 %1006 }
 0xcde   :  { %v1014_v62 = vsub.f32 %v994_v48, %v1010_v34  ;;  %v1011_v8 = vmul.f32 0.03125, %v1007_v61  ;;  %v1020_v20 = vsel %vm32_vm0, %v1016_v7, 0.0  ;;  %v1017_v63 = vmul.f32 %v1013_v58, %v1013_v58  ;;  %v3155_v34 = vld [vmem:[%s3439_s2] sm:$0xff] }
 0xcdf   :  { %1021 = vadd.xlane.f32.xlu0 %v1020_v20 }
 0xce0   :  { %v1015_v0 = vsub.f32 %v995_v50, %v1011_v8  ;;  %v1023_v2 = vsel %vm32_vm0, %v1017_v63, 0.0  ;;  %v1018_v3 = vmul.f32 %v1014_v62, %v1014_v62  ;;  %v3161_v8 = vld [vmem:[%s3439_s2 + $0x18] sm:$0xff]  ;;  %v3167_v63 = vld [vmem:[%s3439_s2 + $0x8] sm:$0xff] }
 0xce1   :  { %1024 = vadd.xlane.f32.xlu1 %v1023_v2 }
 0xce2   :  { %v1026_v5 = vsel %vm32_vm0, %v1018_v3, 0.0  ;;  %v1019_v6 = vmul.f32 %v1015_v0, %v1015_v0  ;;  %v3174_v3 = vld [vmem:[%s3439_s2 + $0x10] sm:$0xff] }
 0xce3   :  { %1027 = vadd.xlane.f32.xlu0 %v1026_v5 }
 0xce4   :  { %v1029_v9 = vsel %vm32_vm0, %v1019_v6, 0.0 }
 0xce5   :  { %1030 = vadd.xlane.f32.xlu1 %v1029_v9 }
 0xd6c   :  { %v1022_v21 = vpop.xlane.xlu0 %1021 }
 0xd6d   :  { %v1032_v22 = vmul.f32 0.03125, %v1022_v21 }
 0xd6e   :  { %v1025_v1 = vpop.xlane.xlu1 %1024 }
 0xd6f   :  { %v1036_v23 = vadd.f32 1e-12, %v1032_v22  ;;  %v1033_v4 = vmul.f32 0.03125, %v1025_v1 }
 0xd70   :  { %v1028_v24 = vpop.xlane.xlu0 %1027 }
 0xd71   :  { %2702 = vrsqrt.f32 %v1036_v23  ;;  %v1037_v25 = vadd.f32 1e-12, %v1033_v4  ;;  %v1034_v26 = vmul.f32 0.03125, %v1028_v24 }
 0xd72   :  { %v1031_v28 = vpop.xlane.xlu1 %1030 }
 0xd73   :  { %2704 = vrsqrt.f32 %v1037_v25  ;;  %v1038_v12 = vadd.f32 1e-12, %v1034_v26  ;;  %v1035_v29 = vmul.f32 0.03125, %v1031_v28 }
 0xd75   :  { %2706 = vrsqrt.f32 %v1038_v12  ;;  %v1039_v32 = vadd.f32 1e-12, %v1035_v29 }
 0xd77   :  { %2708 = vrsqrt.f32 %v1039_v32 }
 0xd7b   :  { %v2703_v27 = vpop.eup %2702 }
 0xd7c   :  { %v1044_v15 = vmul.f32 %v2703_v27, %v1012_v56 }
 0xd7d   :  { %v2705_v54 = vpop.eup %2704 }
 0xd7e   :  { %v1045_v13 = vmul.f32 %v2705_v54, %v1013_v58  ;;  %v1052_v44 = vmul.f32 %v2309_v19, %v1044_v15 }
 0xd7f   :  { %v2707_v33 = vpop.eup %2706 }
 0xd80   :  { %v1046_v17 = vmul.f32 %v2707_v33, %v1014_v62  ;;  %v1053_v36 = vmul.f32 %v2309_v19, %v1045_v13  ;;  %v3119_v39 = vadd.f32 %v2310_v35, %v1052_v44 }
 0xd81   :  { %v2709_v46 = vpop.eup %2708 }
 0xd82   :  { %v1054_v18 = vmul.f32 %v2309_v19, %v1046_v17  ;;  %v1047_v37 = vmul.f32 %v2709_v46, %v1015_v0  ;;  %v3121_v16 = vadd.f32 %v2310_v35, %v1053_v36 }
 0xd84   :  { %v1055_v42 = vmul.f32 %v2309_v19, %v1047_v37  ;;  %v1092_v47 = vpack.c.bf16 %v3121_v16, %v3119_v39  ;;  %v3126_v14 = vadd.f32 %v2310_v35, %v1054_v18 }
 0xd86   :  { %2497 = vmatprep.mubr.msk.bf16.mxu0 %vm32_vm0, %v1092_v47  ;;  %v3128_v38 = vadd.f32 %v2310_v35, %v1055_v42 }
 0xd88   :  { %v1093_v45 = vpack.c.bf16 %v3128_v38, %v3126_v14 }
 0xd8a   :  { %2498 = vmatmul.mubr.msk.bf16.vlgmr.msra.gmra.mrb[16].mxu0 %vm32_vm0, %v1093_v45 }
 0xe5d   :  { %v2499_v40 = vpop.f32.mrb[16].mxu0 }
 0xe5e   :  { %v1150_v43 = vpop.f32.mrb[17].mxu0  ;;  %v1159_v59 = vadd.f32 %v2499_v40, %v2311_v41 }
 0xe5f   :  { %v2500_v55 = vpop.f32.mrb[18].mxu0  ;;  %v1151_v50 = vadd.f32 %v2311_v41, %v1150_v43 }
 0xe60   :  { %v1162_v48 = vadd.f32 %v2500_v55, %v2311_v41  ;;  %v1153_v49 = vpop.f32.mrb[19].mxu0 }
 0xe61   :  { %v1154_v51 = vadd.f32 %v2311_v41, %v1153_v49 }
 0xe62   :  { %v3136_v60 = vpack.c.bf16 %v1162_v48, %v1159_v59 }
 0xe63   :  { %v3138_v52 = vpack.c.bf16 %v1154_v51, %v1151_v50 }
 0xe64   :  { %1171 = vrot.lane.b32.xlu1 %v3136_v60, %s2782_s10 }
 0xe65   :  { %1169 = vrot.lane.b32.xlu0 %v3138_v52, %s2782_s10  ;;  %2505 = vmatprep.mubr.msk.bf16.mxu0 %vm211_vm1, %v3138_v52 }
 0xed6   :  { %v1172_v56 = vpop.permute.xlu1 %1171 }
 0xed7   :  { %v1170_v30 = vpop.permute.xlu0 %1169  ;;  %v1183_v57 = vsel %vm211_vm1, %v1172_v56, 0 }
 0xed8   :  { %v1180_v53 = vsel %vm211_vm1, %v1170_v30, 0  ;;  %2581 = vmatprep.subr.msk.bf16.mxu0 %vm211_vm1, %v1170_v30 }
 0xed9   :  { %2502 = vmatpush3.bf16.xpose.msra.mxu0 %v1180_v53 }
 0xeda   :  { %2582 = vmatprep.subr.msk.bf16.mxu0 %vm211_vm1, %v1172_v56 }
 0xee1   :  { %2504 = vmatpush3.bf16.xpose.msra.mxu0 %v1183_v57 }
 0xee8   :  { %2506 = vmatmul.mubr.msk.bf16.vlgmr.msra.gmra.mrb[20].mxu0 %vm211_vm1, %v3136_v60 }
 0xfbb   :  { %v2507_v31 = vpop.f32.mrb[20].mxu0 }
 0xfbc   :  { %v1219_v58 = vpop.f32.mrb[21].mxu0  ;;  %v1228_v5 = vadd.f32 %v3174_v3, %v2507_v31 }
 0xfbd   :  { %v1220_v7 = vadd.f32 %v3155_v34, %v1219_v58  ;;  %v2508_v61 = vpop.f32.mrb[22].mxu0 }
 0xfbe   :  { %v1222_v62 = vpop.f32.mrb[23].mxu0  ;;  %v1231_v20 = vadd.f32 %v3161_v8, %v2508_v61  ;;  %v1240_v10 = vsel %vm32_vm0, %v1228_v5, -inf }
 0xfbf   :  { %v1223_v0 = vadd.f32 %v3167_v63, %v1222_v62  ;;  %v1234_v2 = vsel %vm32_vm0, %v1220_v7, -inf }
 0xfc0   :  { %1235 = vmax.xlane.f32.xlu1 %v1234_v2  ;;  %v1243_v9 = vsel %vm32_vm0, %v1231_v20, -inf }
 0xfc1   :  { %v1237_v6 = vsel %vm32_vm0, %v1223_v0, -inf }
 0xfc2   :  { %1238 = vmax.xlane.f32.xlu0 %v1237_v6 }
 0xfc4   :  { %1244 = vmax.xlane.f32.xlu1 %v1243_v9 }
 0xfc6   :  { %1241 = vmax.xlane.f32.xlu0 %v1240_v10 }
 0xfd5   :  { %1282 = vrot.lane.b32.xlu1 %v3136_v60, %s2783_s19 }
0x104d   :  { %v1236_v11 = vpop.xlane.xlu1 %1235 }
0x104e   :  { %v1246_v23 = vsub.f32 %v1220_v7, %v1236_v11 }
0x104f   :  { %v1239_v21 = vpop.xlane.xlu0 %1238 }
0x1050   :  { %v1247_v22 = vsub.f32 %v1223_v0, %v1239_v21  ;;  %v1250_v12 = vmul.f32 1.442695, %v1246_v23 }
0x1051   :  { %v1245_v1 = vpop.xlane.xlu1 %1244 }
0x1052   :  { %v1249_v4 = vsub.f32 %v1231_v20, %v1245_v1  ;;  %v1252_v24 = vmul.f32 1.442695, %v1247_v22 }
0x1053   :  { %v1242_v25 = vpop.xlane.xlu0 %1241 }
0x1054   :  { %v1256_v26 = vmul.f32 1.442695, %v1249_v4  ;;  %v1248_v28 = vsub.f32 %v1228_v5, %v1242_v25 }
0x1055   :  { %v1283_v35 = vpop.permute.xlu1 %1282 }
0x1056   :  { %2710 = vpow2.f32 %v1256_v26  ;;  %v1254_v29 = vmul.f32 1.442695, %v1248_v28 }
0x1057   :  { %2712 = vpow2.f32 %v1252_v24 }
0x1058   :  { %2714 = vpow2.f32 %v1254_v29 }
0x1059   :  { %2716 = vpow2.f32 %v1250_v12 }
0x1060   :  { %v2711_v32 = vpop.eup %2710 }
0x1061   :  { %v2713_v27 = vpop.eup %2712  ;;  %v1267_v19 = vsel %vm32_vm0, %v2711_v32, 0.0 }
0x1062   :  { %v2715_v15 = vpop.eup %2714  ;;  %1268 = vadd.xlane.f32.xlu1 %v1267_v19  ;;  %v1261_v44 = vsel %vm32_vm0, %v2713_v27, 0.0 }
0x1063   :  { %v1264_v54 = vsel %vm32_vm0, %v2715_v15, 0.0  ;;  %v2717_v13 = vpop.eup %2716 }
0x1064   :  { %1265 = vadd.xlane.f32.xlu0 %v1264_v54  ;;  %v1258_v33 = vsel %vm32_vm0, %v2717_v13, 0.0 }
0x1066   :  { %1262 = vadd.xlane.f32.xlu1 %v1261_v44 }
0x1068   :  { %1259 = vadd.xlane.f32.xlu0 %v1258_v33 }
0x1077   :  { %1345 = vrot.lane.b32.xlu1 %v3138_v52, %s2784_s20 }
0x107b   :  { %1347 = vrot.lane.b32.xlu1 %v3136_v60, %s2784_s20 }
0x107e   :  { %1280 = vrot.lane.b32.xlu0 %v3138_v52, %s2783_s19 }
0x107f   :  { %1343 = vrot.lane.b32.xlu1 %v3136_v60, %s2785_s21 }
0x1082   :  { %1341 = vrot.lane.b32.xlu0 %v3138_v52, %s2785_s21 }
0x10ef   :  { %v1269_v17 = vpop.xlane.xlu1 %1268 }
0x10f1   :  { %v1266_v36 = vpop.xlane.xlu0 %1265 }
0x10f2   :  { %2718 = vrcp.f32 %v1266_v36 }
0x10f3   :  { %v1263_v46 = vpop.xlane.xlu1 %1262 }
0x10f4   :  { %2720 = vrcp.f32 %v1263_v46 }
0x10f5   :  { %2722 = vrcp.f32 %v1269_v17  ;;  %v1260_v18 = vpop.xlane.xlu0 %1259 }
0x10f6   :  { %2724 = vrcp.f32 %v1260_v18 }
0x10f7   :  { %v1346_v40 = vpop.permute.xlu1 %1345 }
0x10f8   :  { %v1356_v30 = vsel %vm211_vm1, %v1346_v40, 0 }
0x10f9   :  { %v1281_v37 = vpop.permute.xlu0 %1280 }
0x10fa   :  { %2509 = vmatprep.subr.bf16.mxu1 %v1281_v37 }
0x10fb   :  { %2510 = vmatpush3.bf16.msra.mxu1 %v1281_v37  ;;  %v1348_v53 = vpop.permute.xlu1 %1347 }
0x10fc   :  { %2511 = vmatprep.subr.bf16.mxu1 %v1283_v35  ;;  %v2719_v42 = vpop.eup %2718  ;;  %v1359_v56 = vsel %vm211_vm1, %v1348_v53, 0 }
0x10fd   :  { %v1276_v43 = vmul.f32 %v2719_v42, %v2715_v15  ;;  %v1342_v51 = vpop.permute.xlu0 %1341 }
0x10fe   :  { %v2721_v47 = vpop.eup %2720 }
0x10ff   :  { %v2723_v45 = vpop.eup %2722  ;;  %2512 = vmatpush3.bf16.msra.mxu1 %v1283_v35  ;;  %v1275_v59 = vmul.f32 %v2721_v47, %v2713_v27  ;;  %v1344_v57 = vpop.permute.xlu1 %1343 }
0x1100   :  { %v2725_v41 = vpop.eup %2724  ;;  %2583 = vmatprep.subr.msk.bf16.mxu1 %vm211_vm1, %v1346_v40  ;;  %v1277_v48 = vmul.f32 %v2723_v45, %v2711_v32 }
0x1101   :  { %v1274_v55 = vmul.f32 %v2725_v41, %v2717_v13 }
0x1102   :  { %v1279_v50 = vpack.c.bf16 %v1277_v48, %v1276_v43  ;;  %v2626_v48 = vld [vmem:[%s3437_s3 + $0x60] sm:$0xff]  }
0x1103   :  { %v1278_v49 = vpack.c.bf16 %v1275_v59, %v1274_v55 }
0x1105   :  { %2513 = vmatprep.mubr.msk.bf16.mxu1 %vm32_vm0, %v1278_v49  ;;  %v2627_v49 = vld [vmem:[%s3437_s3 + $0x68] sm:$0xff]  }
0x1106   :  { %2514 = vmatmul.mubr.msk.bf16.vlgmr.msra.gmra.mrb[16].mxu1 %vm32_vm0, %v1279_v50 }
0x1107   :  { %2521 = vmatprep.mubr.msk.bf16.mxu1 %vm211_vm1, %v1342_v51 }
0x1108   :  { %2518 = vmatpush3.bf16.xpose.msra.mxu1 %v1356_v30 }
0x1109   :  { %2584 = vmatprep.subr.msk.bf16.mxu1 %vm211_vm1, %v1348_v53 }
0x1110   :  { %2520 = vmatpush3.bf16.xpose.msra.mxu1 %v1359_v56 }
0x1117   :  { %2522 = vmatmul.mubr.msk.bf16.vlgmr.msra.gmra.mrb[20].mxu1 %vm211_vm1, %v1344_v57 }
0x11d9   :  { %v3204_v31 = vpop.f32.mrb[16].mxu1 }
0x11da   :  { %v3206_v58 = vpop.f32.mrb[17].mxu1 }
0x11db   :  { %v3208_v7 = vpop.f32.mrb[18].mxu1 }
0x11dc   :  { %v3210_v61 = vpop.f32.mrb[19].mxu1 }
0x11ea   :  { %v2523_v62 = vpop.f32.mrb[20].mxu1 }
0x11eb   :  { %v1395_v20 = vpop.f32.mrb[21].mxu1  ;;  %v1404_v6 = vadd.f32 %v3174_v3, %v2523_v62 }
0x11ec   :  { %v1396_v0 = vadd.f32 %v3155_v34, %v1395_v20  ;;  %v2524_v2 = vpop.f32.mrb[22].mxu1 }
0x11ed   :  { %v1398_v5 = vpop.f32.mrb[23].mxu1  ;;  %v1407_v21 = vadd.f32 %v3161_v8, %v2524_v2  ;;  %v1416_v22 = vsel %vm32_vm0, %v1404_v6, -inf }
0x11ee   :  { %v1399_v9 = vadd.f32 %v3167_v63, %v1398_v5  ;;  %v1410_v10 = vsel %vm32_vm0, %v1396_v0, -inf }
0x11ef   :  { %1411 = vmax.xlane.f32.xlu0 %v1410_v10  ;;  %v1419_v1 = vsel %vm32_vm0, %v1407_v21, -inf }
0x11f0   :  { %v1413_v11 = vsel %vm32_vm0, %v1399_v9, -inf }
0x11f1   :  { %1414 = vmax.xlane.f32.xlu1 %v1413_v11 }
0x11f3   :  { %1417 = vmax.xlane.f32.xlu0 %v1416_v22 }
0x11f7   :  { %1420 = vmax.xlane.f32.xlu0 %v1419_v1 }
0x127c   :  { %v1412_v34 = vpop.xlane.xlu0 %1411 }
0x127d   :  { %v1422_v23 = vsub.f32 %v1396_v0, %v1412_v34 }
0x127e   :  { %v1415_v4 = vpop.xlane.xlu1 %1414 }
0x127f   :  { %v1426_v63 = vmul.f32 1.442695, %v1422_v23  ;;  %v1423_v25 = vsub.f32 %v1399_v9, %v1415_v4 }
0x1280   :  { %v1418_v3 = vpop.xlane.xlu0 %1417 }
0x1281   :  { %v1424_v24 = vsub.f32 %v1404_v6, %v1418_v3  ;;  %v1428_v29 = vmul.f32 1.442695, %v1423_v25 }
0x1283   :  { %v1430_v26 = vmul.f32 1.442695, %v1424_v24 }
0x1284   :  { %v1421_v28 = vpop.xlane.xlu0 %1420 }
0x1285   :  { %2726 = vpow2.f32 %v1430_v26  ;;  %v1425_v12 = vsub.f32 %v1407_v21, %v1421_v28 }
0x1286   :  { %2728 = vpow2.f32 %v1426_v63 }
0x1287   :  { %v1432_v8 = vmul.f32 1.442695, %v1425_v12 }
0x1289   :  { %2730 = vpow2.f32 %v1432_v8 }
0x128a   :  { %2732 = vpow2.f32 %v1428_v29 }
0x128f   :  { %v2727_v32 = vpop.eup %2726 }
0x1290   :  { %v1440_v27 = vsel %vm32_vm0, %v2727_v32, 0.0  ;;  %v2729_v19 = vpop.eup %2728 }
0x1291   :  { %1441 = vadd.xlane.f32.xlu0 %v1440_v27  ;;  %v1434_v54 = vsel %vm32_vm0, %v2729_v19, 0.0 }
0x1293   :  { %v2731_v15 = vpop.eup %2730 }
0x1294   :  { %v1443_v13 = vsel %vm32_vm0, %v2731_v15, 0.0  ;;  %v2733_v44 = vpop.eup %2732 }
0x1295   :  { %1435 = vadd.xlane.f32.xlu0 %v1434_v54  ;;  %1444 = vadd.xlane.f32.xlu1 %v1443_v13  ;;  %v1437_v33 = vsel %vm32_vm0, %v2733_v44, 0.0 }
0x1299   :  { %1438 = vadd.xlane.f32.xlu1 %v1437_v33 }
0x12aa   :  { %1458 = vrot.lane.b32.xlu1 %v3136_v60, %s2786_s22 }
0x12ab   :  { %1456 = vrot.lane.b32.xlu0 %v3138_v52, %s2786_s22 }
0x131e   :  { %v1442_v35 = vpop.xlane.xlu0 %1441 }
0x1322   :  { %v1445_v17 = vpop.xlane.xlu1 %1444  ;;  %v1436_v36 = vpop.xlane.xlu0 %1435 }
0x1323   :  { %2734 = vrcp.f32 %v1445_v17 }
0x1324   :  { %2736 = vrcp.f32 %v1436_v36 }
0x1325   :  { %2738 = vrcp.f32 %v1442_v35 }
0x1326   :  { %v1439_v46 = vpop.xlane.xlu1 %1438  ;;  %v1457_v18 = vpop.permute.xlu0 %1456 }
0x1327   :  { %2740 = vrcp.f32 %v1439_v46  ;;  %2525 = vmatprep.subr.bf16.mxu0 %v1457_v18 }
0x1328   :  { %2526 = vmatpush3.bf16.msra.mxu0 %v1457_v18 }
0x132a   :  { %v1459_v37 = vpop.permute.xlu1 %1458 }
0x132b   :  { %2527 = vmatprep.subr.bf16.mxu0 %v1459_v37 }
0x132c   :  { %2528 = vmatpush3.bf16.msra.mxu0 %v1459_v37 }
0x132d   :  { %v2735_v42 = vpop.eup %2734  ;;  %2533 = vmatprep.subr.bf16.mxu0 %v2626_v48 }
0x132e   :  { %v2737_v47 = vpop.eup %2736  ;;  %v1453_v40 = vmul.f32 %v2735_v42, %v2731_v15 }
0x132f   :  { %v2739_v60 = vpop.eup %2738  ;;  %v1450_v52 = vmul.f32 %v2737_v47, %v2729_v19 }
0x1330   :  { %v1452_v43 = vmul.f32 %v2739_v60, %v2727_v32 }
0x1331   :  { %v2741_v45 = vpop.eup %2740 }
0x1332   :  { %v1451_v41 = vmul.f32 %v2741_v45, %v2733_v44  ;;  %v1455_v59 = vpack.c.bf16 %v1453_v40, %v1452_v43  ;;  %v2628_v45 = vld [vmem:[%s3437_s3 + $0x70] sm:$0xff]   ;;  %v2629_v40 = vld [vmem:[%s3437_s3 + $0x78] sm:$0xff]  }
0x1333   :  { %2541 = vmatprep.subr.bf16.mxu1 %v2628_v45 }
0x1334   :  { %v1454_v55 = vpack.c.bf16 %v1451_v41, %v1450_v52  ;;  %2542 = vmatpush3.bf16.msra.mxu1 %v2628_v45 }
0x1335   :  { %2543 = vmatprep.subr.bf16.mxu1 %v2629_v40 }
0x1336   :  { %2529 = vmatprep.mubr.msk.bf16.mxu0 %vm32_vm0, %v1454_v55 }
0x1337   :  { %2530 = vmatmul.mubr.msk.bf16.vlgmr.msra.gmra.mrb[24].mxu0 %vm32_vm0, %v1455_v59 }
0x1338   :  { %2534 = vmatpush3.bf16.msra.mxu0 %v2626_v48  ;;  %2544 = vmatpush3.bf16.msra.mxu1 %v2629_v40 }
0x1339   :  { %2535 = vmatprep.subr.bf16.mxu0 %v2627_v49 }
0x133c   :  { %2536 = vmatpush3.bf16.msra.mxu0 %v2627_v49 }
0x140a   :  { %v2531_v50 = vpop.f32.mrb[24].mxu0 }
0x140b   :  { %v1502_v51 = vpop.f32.mrb[25].mxu0 }
0x140c   :  { %v2532_v30 = vpop.f32.mrb[26].mxu0 }
0x140d   :  { %v2609_v53 = vpack.i.bf16 %v2532_v30, %v2531_v50  ;;  %v1505_v56 = vpop.f32.mrb[27].mxu0 }
0x140e   :  { %v2604_v57 = vpack.i.bf16 %v1505_v56, %v1502_v51 }
0x1410   :  { %2605 = vrot.lane.b32.xlu1 %v2604_v57, %s2787_s26 }
0x1414   :  { %2610 = vrot.lane.b32.xlu1 %v2609_v53, %s2787_s26 }
0x1482   :  { %v2606_v62 = vpop.permute.xlu1 %2605 }
0x1483   :  { %v2608_v20 = vunpack.i.h.bf16 %v2606_v62  ;;  %v2607_v0 = vunpack.i.l.bf16 %v2606_v62  ;;  %v2329_v62 = vld [vmem:[%s3438_s4 + $0xc] ss:$0 sm:$0xff] }
0x1485   :  { %v1534_v2 = vsel %vm211_vm1, %v3210_v61, %v2608_v20  ;;  %v1533_v5 = vsel %vm211_vm1, %v3206_v58, %v2607_v0  ;;  %v2324_v61 = vld [vmem:[%s3438_s4 + $0xb] ss:$0 sm:$0xff] }
0x1486   :  { %v1537_v6 = vpack.c.bf16 %v1534_v2, %v1533_v5  ;;  %v2611_v9 = vpop.permute.xlu1 %2610 }
0x1487   :  { %v2613_v10 = vunpack.i.h.bf16 %v2611_v9  ;;  %v2612_v11 = vunpack.i.l.bf16 %v2611_v9  ;;  %v2330_v9 = vld [vmem:[%s3438_s4 + $0xd] ss:$0 sm:$0xff] }
0x1488   :  { %2537 = vmatprep.mubr.msk.bf16.mxu0 %vm32_vm0, %v1537_v6 }
0x1489   :  { %v1536_v21 = vsel %vm211_vm1, %v3208_v7, %v2613_v10  ;;  %v1535_v22 = vsel %vm211_vm1, %v3204_v31, %v2612_v11  ;;  %vm2245_vm1 = vcmask 125952  }
0x148a   :  { %v1538_v1 = vpack.c.bf16 %v1536_v21, %v1535_v22 }
0x148c   :  { %2538 = vmatmul.mubr.msk.bf16.vlgmr.msra.gmra.mrb[28].mxu0 %vm32_vm0, %v1538_v1 }
0x155f   :  { %v2539_v58 = vpop.f32.mrb[28].mxu0 }
0x1560   :  { %v1595_v34 = vpop.f32.mrb[29].mxu0  ;;  %v1604_v23 = vadd.f32 %v2539_v58, %v2324_v61 }
0x1561   :  { %v1596_v4 = vadd.f32 %v2324_v61, %v1595_v34  ;;  %v2540_v3 = vpop.f32.mrb[30].mxu0 }
0x1562   :  { %v1598_v24 = vpop.f32.mrb[31].mxu0  ;;  %v1607_v7 = vadd.f32 %v2540_v3, %v2324_v61  ;;  %v1612_v28 = vadd.f32 %v1604_v23, %v3126_v14 }
0x1563   :  { %v1599_v63 = vadd.f32 %v2324_v61, %v1598_v24  ;;  %v1610_v25 = vadd.f32 %v1596_v4, %v3119_v39 }
0x1564   :  { %v1620_v29 = vsel %vm32_vm0, %v1612_v28, 0.0  ;;  %v1613_v8 = vadd.f32 %v1607_v7, %v3128_v38  ;;  %v2632_v7 = vld [vmem:[%s3437_s3 + $0x90] sm:$0xff]  }
0x1565   :  { %v1614_v26 = vsel %vm32_vm0, %v1610_v25, 0.0  ;;  %v1611_v31 = vadd.f32 %v1599_v63, %v3121_v16  ;;  %v2630_v63 = vld [vmem:[%s3437_s3 + $0x80] sm:$0xff]  }
0x1566   :  { %1615 = vadd.xlane.f32.xlu0 %v1614_v26  ;;  %v1623_v32 = vsel %vm32_vm0, %v1613_v8, 0.0  ;;  %2549 = vmatprep.subr.bf16.mxu0 %v2630_v63  ;;  %v2633_v26 = vld [vmem:[%s3437_s3 + $0x98] sm:$0xff]  }
0x1567   :  { %v1617_v12 = vsel %vm32_vm0, %v1611_v31, 0.0  ;;  %2550 = vmatpush3.bf16.msra.mxu0 %v2630_v63 }
0x1568   :  { %1618 = vadd.xlane.f32.xlu1 %v1617_v12 }
0x156a   :  { %1621 = vadd.xlane.f32.xlu0 %v1620_v29 }
0x156e   :  { %1624 = vadd.xlane.f32.xlu0 %v1623_v32 }
0x15f3   :  { %v1616_v39 = vpop.xlane.xlu0 %1615 }
0x15f4   :  { %v1626_v27 = vmul.f32 0.03125, %v1616_v39 }
0x15f5   :  { %v1619_v19 = vpop.xlane.xlu1 %1618 }
0x15f6   :  { %v1630_v15 = vsub.f32 %v1610_v25, %v1626_v27  ;;  %v1627_v54 = vmul.f32 0.03125, %v1619_v19  ;;  %v2631_v25 = vld [vmem:[%s3437_s3 + $0x88] sm:$0xff]  }
0x15f7   :  { %v1622_v16 = vpop.xlane.xlu0 %1621  ;;  %2551 = vmatprep.subr.bf16.mxu0 %v2631_v25 }
0x15f8   :  { %v1631_v13 = vsub.f32 %v1611_v31, %v1627_v54  ;;  %v1628_v14 = vmul.f32 0.03125, %v1622_v16  ;;  %v1634_v44 = vmul.f32 %v1630_v15, %v1630_v15  ;;  %2552 = vmatpush3.bf16.msra.mxu0 %v2631_v25  ;;  %v2331_v31 = vld [vmem:[%s3438_s4 + $0xe] ss:$0 sm:$0xff] }
0x15f9   :  { %2553 = vmatprep.subr.bf16.mxu0 %v2632_v7 }
0x15fa   :  { %v1632_v33 = vsub.f32 %v1612_v28, %v1628_v14  ;;  %v1638_v35 = vsel %vm32_vm0, %v1634_v44, 0.0  ;;  %v1635_v17 = vmul.f32 %v1631_v13, %v1631_v13 }
0x15fb   :  { %1639 = vadd.xlane.f32.xlu0 %v1638_v35  ;;  %v1625_v36 = vpop.xlane.xlu0 %1624 }
0x15fc   :  { %v1629_v38 = vmul.f32 0.03125, %v1625_v36  ;;  %v1641_v46 = vsel %vm32_vm0, %v1635_v17, 0.0  ;;  %v1636_v18 = vmul.f32 %v1632_v33, %v1632_v33  ;;  %2554 = vmatpush3.bf16.msra.mxu0 %v2632_v7 }
0x15fd   :  { %1642 = vadd.xlane.f32.xlu1 %v1641_v46  ;;  %2555 = vmatprep.subr.bf16.mxu0 %v2633_v26 }
0x15fe   :  { %v1633_v37 = vsub.f32 %v1613_v8, %v1629_v38  ;;  %v1644_v42 = vsel %vm32_vm0, %v1636_v18, 0.0 }
0x15ff   :  { %1645 = vadd.xlane.f32.xlu0 %v1644_v42 }
0x1600   :  { %v1637_v47 = vmul.f32 %v1633_v37, %v1633_v37  ;;  %2556 = vmatpush3.bf16.msra.mxu0 %v2633_v26 }
0x1602   :  { %v1647_v60 = vsel %vm32_vm0, %v1637_v47, 0.0 }
0x1603   :  { %1648 = vadd.xlane.f32.xlu1 %v1647_v60 }
0x1688   :  { %v1640_v52 = vpop.xlane.xlu0 %1639 }
0x1689   :  { %v1650_v41 = vmul.f32 0.03125, %v1640_v52 }
0x168a   :  { %v1643_v43 = vpop.xlane.xlu1 %1642 }
0x168b   :  { %v1654_v55 = vadd.f32 1e-12, %v1650_v41  ;;  %v1651_v59 = vmul.f32 0.03125, %v1643_v43 }
0x168c   :  { %v1646_v48 = vpop.xlane.xlu0 %1645 }
0x168d   :  { %2742 = vrsqrt.f32 %v1654_v55  ;;  %v1655_v49 = vadd.f32 1e-12, %v1651_v59  ;;  %v1652_v50 = vmul.f32 0.03125, %v1646_v48 }
0x168f   :  { %2744 = vrsqrt.f32 %v1655_v49  ;;  %v1656_v51 = vadd.f32 1e-12, %v1652_v50 }
0x1690   :  { %v1649_v30 = vpop.xlane.xlu1 %1648 }
0x1691   :  { %2746 = vrsqrt.f32 %v1656_v51  ;;  %v1653_v53 = vmul.f32 0.03125, %v1649_v30 }
0x1693   :  { %v1657_v56 = vadd.f32 1e-12, %v1653_v53 }
0x1695   :  { %2748 = vrsqrt.f32 %v1657_v56 }
0x1697   :  { %v2743_v57 = vpop.eup %2742 }
0x1698   :  { %v1662_v20 = vmul.f32 %v2743_v57, %v1630_v15 }
0x1699   :  { %v2745_v0 = vpop.eup %2744 }
0x169a   :  { %v1663_v2 = vmul.f32 %v2745_v0, %v1631_v13  ;;  %v1670_v5 = vmul.f32 %v2329_v62, %v1662_v20 }
0x169b   :  { %v2747_v6 = vpop.eup %2746 }
0x169c   :  { %v1664_v10 = vmul.f32 %v2747_v6, %v1632_v33  ;;  %v1671_v11 = vmul.f32 %v2329_v62, %v1663_v2  ;;  %v3275_v21 = vadd.f32 %v2330_v9, %v1670_v5 }
0x169e   :  { %v3277_v22 = vadd.f32 %v2330_v9, %v1671_v11  ;;  %v1672_v61 = vmul.f32 %v2329_v62, %v1664_v10 }
0x169f   :  { %v2749_v1 = vpop.eup %2748 }
0x16a0   :  { %v1665_v58 = vmul.f32 %v2749_v1, %v1633_v37  ;;  %v1682_v34 = vpack.c.bf16 %v3277_v22, %v3275_v21  ;;  %v3282_v4 = vadd.f32 %v2330_v9, %v1672_v61 }
0x16a2   :  { %v1673_v23 = vmul.f32 %v2329_v62, %v1665_v58  ;;  %2545 = vmatprep.mubr.msk.bf16.mxu1 %vm32_vm0, %v1682_v34 }
0x16a4   :  { %v3284_v3 = vadd.f32 %v2330_v9, %v1673_v23 }
0x16a6   :  { %v1683_v24 = vpack.c.bf16 %v3284_v3, %v3282_v4 }
0x16a8   :  { %2546 = vmatmul.mubr.msk.bf16.vlgmr.msra.gmra.mrb[24].mxu1 %vm32_vm0, %v1683_v24 }
0x177b   :  { %v2547_v28 = vpop.f32.mrb[24].mxu1 }
0x177c   :  { %v3304_v12 = vadd.f32 %v2547_v28, %v2331_v31  ;;  %v1740_v29 = vpop.f32.mrb[25].mxu1 }
0x177d   :  { %v3306_v8 = vadd.f32 %v2331_v31, %v1740_v29  ;;  %v2548_v32 = vpop.f32.mrb[26].mxu1 }
0x177e   :  { %v3309_v39 = vmul.f32 0.70710677, %v3304_v12  ;;  %v3311_v27 = vadd.f32 %v2548_v32, %v2331_v31  ;;  %v1743_v19 = vpop.f32.mrb[27].mxu1 }
0x177f   :  { %v3314_v15 = vmul.f32 0.70710677, %v3306_v8  ;;  %v3316_v54 = vadd.f32 %v2331_v31, %v1743_v19 }
0x1780   :  { %vm1765_vm7 = vcmp.ge.f32.partialorder %v3309_v39, 0.0  ;;  %v1769_v16 = vsub.f32 0.0, %v3309_v39  ;;  %v3321_v13 = vmul.f32 0.70710677, %v3311_v27 }
0x1781   :  { %vm1763_vm8 = vcmp.ge.f32.partialorder %v3314_v15, 0.0  ;;  %v1767_v14 = vsub.f32 0.0, %v3314_v15  ;;  %v3326_v44 = vmul.f32 0.70710677, %v3316_v54 }
0x1782   :  { %v1773_v33 = vsel %vm1765_vm7, %v3309_v39, %v1769_v16  ;;  %vm1766_vm9 = vcmp.ge.f32.partialorder %v3321_v13, 0.0  ;;  %v1770_v35 = vsub.f32 0.0, %v3321_v13  ;;  %v1755_v39 = vmul.f32 0.5, %v3306_v8 }
0x1783   :  { %v1777_v17 = vmul.f32 0.3275911, %v1773_v33  ;;  %v1771_v36 = vsel %vm1763_vm8, %v3314_v15, %v1767_v14  ;;  %vm1764_vm10 = vcmp.ge.f32.partialorder %v3326_v44, 0.0  ;;  %v1768_v18 = vsub.f32 0.0, %v3326_v44 }
0x1784   :  { %v1775_v38 = vmul.f32 0.3275911, %v1771_v36  ;;  %v1774_v46 = vsel %vm1766_vm9, %v3321_v13, %v1770_v35  ;;  %v1829_v41 = vmul.f32 %v1773_v33, %v1773_v33  ;;  %v1827_v43 = vmul.f32 %v1771_v36, %v1771_v36 }
0x1785   :  { %v1781_v37 = vadd.f32 1.0, %v1777_v17  ;;  %v1778_v42 = vmul.f32 0.3275911, %v1774_v46  ;;  %v1772_v60 = vsel %vm1764_vm10, %v3326_v44, %v1768_v18  ;;  %v1830_v48 = vmul.f32 %v1774_v46, %v1774_v46 }
0x1786   :  { %v1779_v47 = vadd.f32 1.0, %v1775_v38  ;;  %v1776_v40 = vmul.f32 0.3275911, %v1772_v60  ;;  %v1833_v59 = vsub.f32 0.0, %v1829_v41  ;;  %v1831_v51 = vsub.f32 0.0, %v1827_v43 }
0x1787   :  { %2750 = vrcp.f32 %v1781_v37  ;;  %v1782_v45 = vadd.f32 1.0, %v1778_v42  ;;  %v1828_v53 = vmul.f32 %v1772_v60, %v1772_v60  ;;  %v1834_v0 = vsub.f32 0.0, %v1830_v48 }
0x1788   :  { %2752 = vrcp.f32 %v1779_v47  ;;  %v1780_v52 = vadd.f32 1.0, %v1776_v40  ;;  %v1839_v62 = vmul.f32 1.442695, %v1833_v59  ;;  %v1835_v5 = vmul.f32 1.442695, %v1831_v51 }
0x1789   :  { %2754 = vrcp.f32 %v1782_v45  ;;  %v1832_v11 = vsub.f32 0.0, %v1828_v53  ;;  %v1841_v23 = vmul.f32 1.442695, %v1834_v0 }
0x178a   :  { %2756 = vrcp.f32 %v1780_v52 }
0x178b   :  { %2758 = vpow2.f32 %v1839_v62  ;;  %v1837_v26 = vmul.f32 1.442695, %v1832_v11 }
0x178c   :  { %2760 = vpow2.f32 %v1835_v5 }
0x178d   :  { %2762 = vpow2.f32 %v1841_v23 }
0x178e   :  { %2764 = vpow2.f32 %v1837_v26 }
0x1791   :  { %v2751_v55 = vpop.eup %2750 }
0x1792   :  { %v2753_v49 = vpop.eup %2752  ;;  %v1793_v50 = vmul.f32 1.0614054, %v2751_v55 }
0x1793   :  { %v1791_v30 = vmul.f32 1.0614054, %v2753_v49  ;;  %v2755_v57 = vpop.eup %2754 }
0x1794   :  { %v1797_v56 = vadd.f32 -1.4531521, %v1793_v50  ;;  %v1794_v6 = vmul.f32 1.0614054, %v2755_v57  ;;  %v2757_v9 = vpop.eup %2756 }
0x1795   :  { %v1795_v20 = vadd.f32 -1.4531521, %v1791_v30  ;;  %v1792_v58 = vmul.f32 1.0614054, %v2757_v9  ;;  %v2759_v42 = vpop.eup %2758 }
0x1796   :  { %v1801_v2 = vmul.f32 %v2751_v55, %v1797_v56  ;;  %v1798_v61 = vadd.f32 -1.4531521, %v1794_v6  ;;  %v2761_v60 = vpop.eup %2760 }
0x1797   :  { %v1799_v10 = vmul.f32 %v2753_v49, %v1795_v20  ;;  %v1796_v25 = vadd.f32 -1.4531521, %v1792_v58  ;;  %v2763_v50 = vpop.eup %2762 }
0x1798   :  { %v1805_v1 = vadd.f32 1.4214138, %v1801_v2  ;;  %v1802_v63 = vmul.f32 %v2755_v57, %v1798_v61  ;;  %v2765_v62 = vpop.eup %2764  ;;  %v1758_v61 = vmul.f32 0.5, %v3311_v27 }
0x1799   :  { %v1803_v34 = vadd.f32 1.4214138, %v1799_v10  ;;  %v1800_v29 = vmul.f32 %v2757_v9, %v1796_v25 }
0x179a   :  { %v1809_v24 = vmul.f32 %v2751_v55, %v1805_v1  ;;  %v1806_v28 = vadd.f32 1.4214138, %v1802_v63  ;;  %v1757_v1 = vmul.f32 0.5, %v3304_v12  ;;  %v2336_v12 = vld [vmem:[%s3438_s4 + $0xf] ss:$0 sm:$0xff] }
0x179b   :  { %v1807_v7 = vmul.f32 %v2753_v49, %v1803_v34  ;;  %v1804_v14 = vadd.f32 1.4214138, %v1800_v29 }
0x179c   :  { %v1813_v31 = vadd.f32 -0.28449672, %v1809_v24  ;;  %v1810_v16 = vmul.f32 %v2755_v57, %v1806_v28  ;;  %v1756_v24 = vmul.f32 0.5, %v3316_v54 }
0x179d   :  { %v1811_v32 = vadd.f32 -0.28449672, %v1807_v7  ;;  %v1808_v36 = vmul.f32 %v2757_v9, %v1804_v14 }
0x179e   :  { %v1817_v19 = vmul.f32 %v2751_v55, %v1813_v31  ;;  %v1814_v17 = vadd.f32 -0.28449672, %v1810_v16 }
0x179f   :  { %v1815_v33 = vmul.f32 %v2753_v49, %v1811_v32  ;;  %v1812_v37 = vadd.f32 -0.28449672, %v1808_v36 }
0x17a0   :  { %v1821_v35 = vadd.f32 0.2548296, %v1817_v19  ;;  %v1818_v18 = vmul.f32 %v2755_v57, %v1814_v17 }
0x17a1   :  { %v1819_v38 = vadd.f32 0.2548296, %v1815_v33  ;;  %v1816_v52 = vmul.f32 %v2757_v9, %v1812_v37 }
0x17a2   :  { %v1825_v46 = vmul.f32 %v2751_v55, %v1821_v35  ;;  %v1822_v40 = vadd.f32 0.2548296, %v1818_v18 }
0x17a3   :  { %v1823_v47 = vmul.f32 %v2753_v49, %v1819_v38  ;;  %v1820_v48 = vadd.f32 0.2548296, %v1816_v52 }
0x17a4   :  { %v1845_v45 = vmul.f32 %v2759_v42, %v1825_v46  ;;  %v1826_v59 = vmul.f32 %v2755_v57, %v1822_v40 }
0x17a5   :  { %v1843_v41 = vmul.f32 %v2761_v60, %v1823_v47  ;;  %v1824_v56 = vmul.f32 %v2757_v9, %v1820_v48 }
0x17a6   :  { %v1849_v43 = vsub.f32 1.0, %v1845_v45  ;;  %v1846_v53 = vmul.f32 %v2763_v50, %v1826_v59 }
0x17a7   :  { %v1847_v51 = vsub.f32 1.0, %v1843_v41  ;;  %v1844_v49 = vmul.f32 %v2765_v62, %v1824_v56 }
0x17a8   :  { %v1853_v30 = vsub.f32 0.0, %v1849_v43  ;;  %v1850_v0 = vsub.f32 1.0, %v1846_v53  ;;  %v2029_v53 = vlaneseq }
0x17a9   :  { %v1851_v20 = vsub.f32 0.0, %v1847_v51  ;;  %v1848_v6 = vsub.f32 1.0, %v1844_v49 }
0x17aa   :  { %v1857_v55 = vsel %vm1765_vm7, %v1849_v43, %v1853_v30  ;;  %v1854_v5 = vsub.f32 0.0, %v1850_v0  ;;  %v21_v30 = vld [vmem:[%s3440_s1] sm:$0xf] }
0x17ab   :  { %v1855_v2 = vsel %vm1763_vm8, %v1847_v51, %v1851_v20  ;;  %v1861_v10 = vadd.f32 1.0, %v1857_v55  ;;  %v1852_v11 = vsub.f32 0.0, %v1848_v6  ;;  %v2025_v62 = vsel %vm2024_vm11, %v21_v30, 0.0 }
0x17ac   :  { %v1858_v57 = vsel %vm1766_vm9, %v1850_v0, %v1854_v5  ;;  %v1859_v9 = vadd.f32 1.0, %v1855_v2  ;;  %v2030_v20 = vshrl.u32 %v2029_v53, 7 }
0x17ad   :  { %v1862_v58 = vadd.f32 1.0, %v1858_v57  ;;  %v1856_v34 = vsel %vm1764_vm10, %v1848_v6, %v1852_v11  ;;  %v1865_v15 = vmul.f32 %v1861_v10, %v1757_v1  ;;  %v2634_v11 = vld [vmem:[%s3437_s3 + $0xa0] sm:$0xff]   ;;  %v2788_v1 = vmov 0.0  }
0x17ae   :  { %v1860_v63 = vadd.f32 1.0, %v1856_v34  ;;  %v1863_v25 = vmul.f32 %v1859_v9, %v1755_v39  ;;  %v2038_v55 = vsub.s32 1, %v2030_v20  ;;  %v2031_v49 = vsub.s32 0, %v2030_v20  ;;  %2561 = vmatprep.subr.bf16.mxu1 %v2788_v1  ;;  %v2635_v9 = vld [vmem:[%s3437_s3 + $0xa8] sm:$0xff]   ;;  %2565 = vmatprep.mubr.msk.bf16.mxu1 %vm2789_vm12, %v2788_v1 }
0x17af   :  { %v1866_v23 = vmul.f32 %v1862_v58, %v1758_v61  ;;  %v2052_v5 = vsub.s32 3, %v2030_v20  ;;  %v2045_v6 = vsub.s32 2, %v2030_v20  ;;  %2562 = vmatpush3.bf16.msra.mxu1 %v2634_v11 }
0x17b0   :  { %v1864_v7 = vmul.f32 %v1860_v63, %v1756_v24  ;;  %v2039_v0 = vrot.slane %v21_v30, %v2038_v55  ;;  %v2032_v2 = vrot.slane %v21_v30, %v2031_v49  ;;  %2563 = vmatprep.subr.bf16.mxu1 %v2788_v1 }
0x17b1   :  { %v1868_v13 = vpack.c.bf16 %v1866_v23, %v1865_v15  ;;  %v2053_v10 = vrot.slane %v21_v30, %v2052_v5  ;;  %v2046_v57 = vrot.slane %v21_v30, %v2045_v6 }
0x17b2   :  { %v1867_v26 = vpack.c.bf16 %v1864_v7, %v1863_v25 }
0x17b3   :  { %2564 = vmatpush3.bf16.msra.mxu1 %v2635_v9 }
0x17b4   :  { %2557 = vmatprep.mubr.msk.bf16.mxu0 %vm936_vm6, %v1867_v26  ;;  %2569 = vmatprep.subr.bf16.mxu1 %v2788_v1 }
0x17b5   :  { %2558 = vmatmul.mubr.msk.bf16.vlgmr.msra.gmra.mrb[32].mxu0 %vm936_vm6, %v1868_v13 }
0x1888   :  { %v2559_v8 = vpop.f32.mrb[32].mxu0 }
0x1889   :  { %v1946_v27 = vadd.f32 %v2559_v8, %v2336_v12  ;;  %v1937_v44 = vpop.f32.mrb[33].mxu0 }
0x188a   :  { %v2560_v31 = vpop.f32.mrb[34].mxu0  ;;  %v1938_v32 = vadd.f32 %v2336_v12, %v1937_v44  ;;  %v2343_v44 = vld [vmem:[%s3438_s4 + $0x10] ss:$0 sm:$0xff] }
0x188b   :  { %v1949_v28 = vadd.f32 %v2560_v31, %v2336_v12  ;;  %v1940_v29 = vpop.f32.mrb[35].mxu0  ;;  %v1954_v54 = vadd.f32 %v1946_v27, %v3282_v4 }
0x188c   :  { %v1941_v19 = vadd.f32 %v2336_v12, %v1940_v29  ;;  %v1952_v17 = vadd.f32 %v1938_v32, %v3275_v21 }
0x188d   :  { %v1962_v16 = vsel %vm32_vm0, %v1954_v54, 0.0  ;;  %v1955_v14 = vadd.f32 %v1949_v28, %v3284_v3  ;;  %v2344_v28 = vld [vmem:[%s3438_s4 + $0x11] ss:$0 sm:$0xff] }
0x188e   :  { %1963 = vadd.xlane.f32.xlu1 %v1962_v16  ;;  %v1953_v33 = vadd.f32 %v1941_v19, %v3277_v22  ;;  %v1956_v38 = vsel %vm32_vm0, %v1952_v17, 0.0 }
0x188f   :  { %v1965_v36 = vsel %vm32_vm0, %v1955_v14, 0.0 }
0x1890   :  { %v1959_v35 = vsel %vm32_vm0, %v1953_v33, 0.0 }
0x1891   :  { %1960 = vadd.xlane.f32.xlu0 %v1959_v35 }
0x1892   :  { %1966 = vadd.xlane.f32.xlu1 %v1965_v36 }
0x1895   :  { %1957 = vadd.xlane.f32.xlu0 %v1956_v38 }
0x191b   :  { %v1964_v4 = vpop.xlane.xlu1 %1963 }
0x191c   :  { %v1970_v46 = vmul.f32 0.03125, %v1964_v4 }
0x191e   :  { %v3369_v18 = vsub.f32 %v1954_v54, %v1970_v46  ;;  %v1961_v37 = vpop.xlane.xlu0 %1960 }
0x191f   :  { %v1969_v3 = vmul.f32 0.03125, %v1961_v37  ;;  %v1967_v42 = vpop.xlane.xlu1 %1966 }
0x1920   :  { %v1971_v47 = vmul.f32 0.03125, %v1967_v42  ;;  %v1978_v22 = vmul.f32 %v3369_v18, %v3369_v18 }
0x1921   :  { %v3373_v60 = vsub.f32 %v1953_v33, %v1969_v3 }
0x1922   :  { %v3375_v21 = vsub.f32 %v1955_v14, %v1971_v47  ;;  %v1958_v45 = vpop.xlane.xlu0 %1957  ;;  %v1986_v40 = vsel %vm32_vm0, %v1978_v22, 0.0 }
0x1923   :  { %v1968_v52 = vmul.f32 0.03125, %v1958_v45  ;;  %1987 = vadd.xlane.f32.xlu1 %v1986_v40  ;;  %v1977_v41 = vmul.f32 %v3373_v60, %v3373_v60 }
0x1924   :  { %v1979_v43 = vmul.f32 %v3375_v21, %v3375_v21 }
0x1925   :  { %v3382_v59 = vsub.f32 %v1952_v17, %v1968_v52  ;;  %v1983_v48 = vsel %vm32_vm0, %v1977_v41, 0.0 }
0x1926   :  { %1984 = vadd.xlane.f32.xlu0 %v1983_v48  ;;  %v1989_v50 = vsel %vm32_vm0, %v1979_v43, 0.0 }
0x1927   :  { %1990 = vadd.xlane.f32.xlu1 %v1989_v50  ;;  %v1976_v51 = vmul.f32 %v3382_v59, %v3382_v59 }
0x1929   :  { %v1980_v56 = vsel %vm32_vm0, %v1976_v51, 0.0 }
0x192a   :  { %1981 = vadd.xlane.f32.xlu0 %v1980_v56 }
0x192e   :  { %2026 = vadd.xlane.f32.xlu0 %v2025_v62 }
0x1938   :  { %2041 = vbcast.lane.b32.xlu1 %v2039_v0, 256 }
0x193c   :  { %2034 = vbcast.lane.b32.xlu1 %v2032_v2, 256 }
0x1940   :  { %2055 = vbcast.lane.b32.xlu1 %v2053_v10, 256 }
0x1944   :  { %2048 = vbcast.lane.b32.xlu0 %v2046_v57, 256 }
0x19b0   :  { %v1988_v61 = vpop.xlane.xlu1 %1987 }
0x19b1   :  { %v1994_v58 = vmul.f32 0.03125, %v1988_v61 }
0x19b3   :  { %v1998_v39 = vadd.f32 1e-12, %v1994_v58  ;;  %v1985_v34 = vpop.xlane.xlu0 %1984 }
0x19b4   :  { %v1993_v15 = vmul.f32 0.03125, %v1985_v34  ;;  %v1991_v23 = vpop.xlane.xlu1 %1990 }
0x19b5   :  { %2766 = vrsqrt.f32 %v1998_v39  ;;  %v1995_v24 = vmul.f32 0.03125, %v1991_v23 }
0x19b6   :  { %v1997_v63 = vadd.f32 1e-12, %v1993_v15 }
0x19b7   :  { %v1999_v25 = vadd.f32 1e-12, %v1995_v24  ;;  %v1982_v13 = vpop.xlane.xlu0 %1981 }
0x19b8   :  { %2768 = vrsqrt.f32 %v1997_v63  ;;  %v1992_v7 = vmul.f32 0.03125, %v1982_v13  ;;  %v2042_v12 = vpop.permute.xlu1 %2041 }
0x19b9   :  { %2770 = vrsqrt.f32 %v1999_v25 }
0x19ba   :  { %v1996_v26 = vadd.f32 1e-12, %v1992_v7 }
0x19bb   :  { %v2027_v8 = vpop.xlane.xlu0 %2026 }
0x19bc   :  { %2772 = vrsqrt.f32 %v1996_v26  ;;  %v2028_v29 = vmax.f32 %v2027_v8, 1e-09  ;;  %v2035_v54 = vpop.permute.xlu1 %2034 }
0x19be   :  { %2774 = vrcp.f32 %v2028_v29 }
0x19bf   :  { %v2767_v27 = vpop.eup %2766  ;;  %v2049_v33 = vpop.permute.xlu0 %2048 }
0x19c0   :  { %v2006_v31 = vmul.f32 %v2767_v27, %v3369_v18  ;;  %v2056_v3 = vpop.permute.xlu1 %2055 }
0x19c2   :  { %v2769_v32 = vpop.eup %2768  ;;  %v2014_v19 = vmul.f32 %v2343_v44, %v2006_v31 }
0x19c3   :  { %v2771_v16 = vpop.eup %2770  ;;  %v2005_v14 = vmul.f32 %v2769_v32, %v3373_v60 }
0x19c4   :  { %v2022_v35 = vadd.f32 %v2344_v28, %v2014_v19  ;;  %v2007_v17 = vmul.f32 %v2771_v16, %v3375_v21 }
0x19c5   :  { %v2013_v36 = vmul.f32 %v2343_v44, %v2005_v14 }
0x19c6   :  { %v2773_v38 = vpop.eup %2772  ;;  %v2059_v4 = vmul.f32 %v2049_v33, %v2022_v35  ;;  %v2015_v46 = vmul.f32 %v2343_v44, %v2007_v17 }
0x19c7   :  { %v2021_v18 = vadd.f32 %v2344_v28, %v2013_v36  ;;  %v2004_v37 = vmul.f32 %v2773_v38, %v3382_v59 }
0x19c8   :  { %v2075_v42 = vsel %vm32_vm0, %v2059_v4, 0.0  ;;  %v2023_v47 = vadd.f32 %v2344_v28, %v2015_v46  ;;  %v2775_v59 = vpop.eup %2774 }
0x19c9   :  { %v2058_v22 = vmul.f32 %v2042_v12, %v2021_v18  ;;  %v2012_v45 = vmul.f32 %v2343_v44, %v2004_v37  ;;  %v2076_v40 = vrot.slane %v2075_v42, 4  ;;  %v2092_v6 = vrot.slane %v2775_v59, 2 }
0x19ca   :  { %v2060_v60 = vmul.f32 %v2056_v3, %v2023_v47  ;;  %v2091_v61 = vrot.slane %v2775_v59, 1  ;;  %v2093_v63 = vrot.slane %v2775_v59, 3  ;;  %v2636_v3 = vld [vmem:[%s3437_s3 + $0xb0] sm:$0xff]   ;;  %v2637_v47 = vld [vmem:[%s3437_s3 + $0xb8] sm:$0xff]   ;;  %s2790_s3 = smov 32  }
0x19cb   :  { %v2068_v52 = vsel %vm32_vm0, %v2058_v22, 0.0  ;;  %v2020_v41 = vadd.f32 %v2344_v28, %v2012_v45  ;;  %v2077_v43 = vadd.f32 %v2076_v40, %v2075_v42 }
0x19cc   :  { %v2069_v21 = vrot.slane %v2068_v52, 4  ;;  %v2082_v48 = vsel %vm32_vm0, %v2060_v60, 0.0 }
0x19cd   :  { %v2057_v50 = vmul.f32 %v2035_v54, %v2020_v41  ;;  %v2083_v51 = vrot.slane %v2082_v48, 4  ;;  %v2078_v53 = vrot.slane %v2077_v43, 2 }
0x19ce   :  { %v2070_v30 = vadd.f32 %v2069_v21, %v2068_v52 }
0x19cf   :  { %v2061_v56 = vsel %vm32_vm0, %v2057_v50, 0.0  ;;  %v2084_v62 = vadd.f32 %v2083_v51, %v2082_v48  ;;  %v2079_v0 = vadd.f32 %v2078_v53, %v2077_v43 }
0x19d0   :  { %v2071_v20 = vrot.slane %v2070_v30, 2  ;;  %v2062_v55 = vrot.slane %v2061_v56, 4 }
0x19d1   :  { %v2085_v49 = vrot.slane %v2084_v62, 2  ;;  %v2080_v10 = vrot.slane %v2079_v0, 1 }
0x19d2   :  { %v2072_v2 = vadd.f32 %v2071_v20, %v2070_v30  ;;  %v2063_v5 = vadd.f32 %v2062_v55, %v2061_v56 }
0x19d3   :  { %v2086_v57 = vadd.f32 %v2085_v49, %v2084_v62  ;;  %v2081_v58 = vadd.f32 %v2080_v10, %v2079_v0 }
0x19d4   :  { %v2073_v11 = vrot.slane %v2072_v2, 1  ;;  %v2064_v9 = vrot.slane %v2063_v5, 2 }
0x19d5   :  { %v2087_v39 = vrot.slane %v2086_v57, 1  ;;  %v2100_v23 = vmul.f32 %v2092_v6, %v2081_v58 }
0x19d6   :  { %v2074_v34 = vadd.f32 %v2073_v11, %v2072_v2  ;;  %v2065_v15 = vadd.f32 %v2064_v9, %v2063_v5 }
0x19d7   :  { %v2088_v24 = vadd.f32 %v2087_v39, %v2086_v57  ;;  %v2112_v7 = vpack.c.bf16 %v2100_v23, %v2100_v23  ;;  %v2258_v54 = vrot.slane %v2100_v23, 6 }
0x19d8   :  { %v2066_v25 = vrot.slane %v2065_v15, 1  ;;  %v2099_v13 = vmul.f32 %v2091_v61, %v2074_v34 }
0x19d9   :  { %v2101_v26 = vmul.f32 %v2093_v63, %v2088_v24  ;;  %v2120_v29 = vunpack.c.l.b16 %v2112_v7 }
0x19da   :  { %v2067_v12 = vadd.f32 %v2066_v25, %v2065_v15  ;;  %v2111_v8 = vpack.c.bf16 %v2099_v13, %v2099_v13  ;;  %v2256_v28 = vrot.slane %v2099_v13, 7 }
0x19db   :  { %v2113_v27 = vpack.c.bf16 %v2101_v26, %v2101_v26  ;;  %v2260_v14 = vrot.slane %v2101_v26, 5  ;;  %v2125_v38 = vrot.slane %v2120_v29, 6 }
0x19dc   :  { %v2098_v44 = vmul.f32 %v2775_v59, %v2067_v12  ;;  %v2119_v31 = vunpack.c.l.b16 %v2111_v8 }
0x19dd   :  { %v2121_v19 = vunpack.c.l.b16 %v2113_v27 }
0x19de   :  { %v2110_v32 = vpack.c.bf16 %v2098_v44, %v2098_v44  ;;  %v2257_v16 = vsel %vm2123_vm13, %v2256_v28, %v2098_v44  ;;  %v2122_v17 = vrot.slane %v2119_v31, 7 }
0x19df   :  { %v2259_v33 = vsel %vm2126_vm14, %v2258_v54, %v2257_v16  ;;  %v2128_v46 = vrot.slane %v2121_v19, 5 }
0x19e0   :  { %v2118_v35 = vunpack.c.l.b16 %v2110_v32  ;;  %v2261_v36 = vsel %vm2129_vm15, %v2260_v14, %v2259_v33 }
0x19e2   :  { %v2124_v4 = vsel %vm2123_vm13, %v2122_v17, %v2118_v35 }
0x19e3   :  { %v2127_v18 = vsel %vm2126_vm14, %v2125_v38, %v2124_v4 }
0x19e4   :  { %v2130_v37 = vsel %vm2129_vm15, %v2128_v46, %v2127_v18 }
0x19e5   :  { %v2131_v42 = vpack.c.b16 %v2130_v37, %v2130_v37 }
0x19e7   :  { %2566 = vmatmul.mubr.msk.bf16.vlgmr.msra.gmra.mrb[28].mxu1 %vm32_vm0, %v2131_v42 }
0x19e8   :  { %2570 = vmatpush3.bf16.msra.mxu1 %v2636_v3  ;;  %2573 = vmatprep.mubr.msk.bf16.mxu1 %vm2789_vm12, %v2788_v1 }
0x19e9   :  { %2571 = vmatprep.subr.bf16.mxu1 %v2788_v1 }
0x19ec   :  { %2572 = vmatpush3.bf16.msra.mxu1 %v2637_v47 }
0x1aba   :  { %v2181_v22 = vpop.f32.mrb[28].mxu1 }
0x1abb   :  { %v2187_v45 = vmax.f32 %v2181_v22, 0.0  ;;  %v2567_v40 = vpop.f32.mrb[29].mxu1 }
0x1abc   :  { %v2184_v60 = vpop.f32.mrb[30].mxu1 }
0x1abd   :  { %v2188_v52 = vpack.c.bf16 %v2187_v45, %v2187_v45  ;;  %v2568_v41 = vpop.f32.mrb[31].mxu1 }
0x1abf   :  { %2574 = vmatmul.mubr.msk.bf16.vlgmr.msra.gmra.mrb[32].mxu1 %vm32_vm0, %v2188_v52 }
0x1b92   :  { %v2238_v21 = vpop.f32.mrb[32].mxu1 }
0x1b93   :  { %v2244_v43 = vmul.f32 %v2238_v21, %v2238_v21  ;;  %v2575_v48 = vpop.f32.mrb[33].mxu1 }
0x1b94   :  { %v2241_v50 = vpop.f32.mrb[34].mxu1 }
0x1b95   :  { %v2576_v51 = vpop.f32.mrb[35].mxu1  ;;  %v2246_v1 = vsel %vm2245_vm1, %v2244_v43, 0.0 }
0x1b96   :  { %2247 = vadd.xlane.f32.xlu1 %v2246_v1 }
0x1c23   :  { %v2248_v30 = vpop.xlane.xlu1 %2247 }
0x1c24   :  { %v2249_v53 = vmax.f32 %v2248_v30, 1e-24 }
0x1c26   :  { %2776 = vrsqrt.f32 %v2249_v53 }
0x1c30   :  { %v2777_v59 = vpop.eup %2776 }
0x1c31   :  { %v2251_v56 = vmul.f32 %v2777_v59, %v2238_v21 }
0x1c33   :  { %2264 = vrot.lane.b32.xlu0 %v2251_v56, %s2790_s3 }
0x1ca5   :  { %v2265_v62 = vpop.permute.xlu0 %2264 }
0x1ca6   :  { %v2267_v20 = vsel %vm32_vm0, %v2261_v36, %v2265_v62 }
0x1ca7   :  { %v2269_v55 = vsel %vm2268_vm2, %v2267_v20, 0.0 }
0x1ca8   :  { %2270 = vst [vmem:[%s3441_s5] sm:$0xf] %v2269_v55 }

</bundles_post_ra>
